<compile_context>
chip_gen: v6e
topology: v6e:2x2x1
jax: 0.10.0
libtpu: 0.0.40
codegen_flags: <defaults>
</compile_context>

<pallas_src>
import jax
import jax.numpy as jnp
import numpy as np
from jax.experimental import pallas as pl
from jax.experimental.pallas import tpu as pltpu


def _round_up(x, m):
    return (x + m - 1) // m * m


def _gru_decode_kernel(x_ref,            # (T, Hp)   bf16  embedded tokens
                       wih_ref,          # (Hp, 3Hp) bf16  W_ih^T fused (r|z|n)
                       bih_ref,          # (1, 3Hp)  f32
                       whh_ref,          # (Hp, 3Hp) bf16  W_hh^T fused (r|z|n)
                       bhh_ref,          # (1, 3Hp)  f32
                       h0_ref,           # (1, Hp)   f32
                       wdec_ref,         # (Hp, Op)  bf16  W_dec^T
                       bdec_ref,         # (1, Op)   f32
                       logits_ref,       # (T, Op)   f32   output
                       hT_ref,           # (1, Hp)   f32   output (final hidden)
                       gi_ref,           # (T, 3Hp)  f32   VMEM scratch
                       hs_ref):          # (T, Hp)   f32   VMEM scratch
    T = gi_ref.shape[0]
    Hp = hs_ref.shape[1]

    # --- hoisted input path: one (T, Hp) @ (Hp, 3Hp) matmul for all steps ---
    gi_ref[...] = (jnp.dot(x_ref[...], wih_ref[...],
                           preferred_element_type=jnp.float32) + bih_ref[...])

    whh = whh_ref[...]
    bhh = bhh_ref[...]

    # --- recurrence: h carried in vregs, one fused MXU dot per step ---
    def step(t, h):
        gi = gi_ref[pl.ds(t, 1), :]                              # (1, 3Hp) f32
        gh = jnp.dot(h.astype(jnp.bfloat16), whh,
                     preferred_element_type=jnp.float32) + bhh   # (1, 3Hp) f32
        # PyTorch GRU gate order: r, z, n (128-aligned lane slices are free).
        r = jax.nn.sigmoid(gi[:, 0:Hp] + gh[:, 0:Hp])
        z = jax.nn.sigmoid(gi[:, Hp:2 * Hp] + gh[:, Hp:2 * Hp])
        n = jnp.tanh(gi[:, 2 * Hp:3 * Hp] + r * gh[:, 2 * Hp:3 * Hp])
        h_new = (1.0 - z) * n + z * h                            # (1, Hp) f32
        hs_ref[pl.ds(t, 1), :] = h_new
        return h_new

    h_final = jax.lax.fori_loop(0, T, step, h0_ref[...], unroll=True)
    hT_ref[...] = h_final

    # --- batched decoder: one (T, Hp) @ (Hp, Op) matmul, lane-dense store ---
    logits_ref[...] = (jnp.dot(hs_ref[...].astype(jnp.bfloat16), wdec_ref[...],
                               preferred_element_type=jnp.float32)
                       + bdec_ref[...])


def prepare_params(raw):
    """One-time weight prep: fuse gates, transpose to (in, out), pad H/O to
    multiples of 128 (lane-dense), cast matmul weights to bf16."""
    emb = raw["emb"]
    V, H = emb.shape
    O = raw["w_dec"].shape[0]
    Hp = _round_up(H, 128)
    Op = _round_up(O, 128)

    def pad2(a, r, c):
        a = jnp.asarray(a, jnp.float32)
        return jnp.zeros((r, c), jnp.float32).at[:a.shape[0], :a.shape[1]].set(a)

    # (3H, H) PyTorch layout -> per-gate (in, out), padded per gate so each
    # gate block starts at a 128-aligned column offset g*Hp.
    w_ih_g = raw["w_ih"].reshape(3, H, H).transpose(0, 2, 1)   # (3, in, out)
    w_hh_g = raw["w_hh"].reshape(3, H, H).transpose(0, 2, 1)
    b_ih_g = raw["b_ih"].reshape(3, 1, H)
    b_hh_g = raw["b_hh"].reshape(3, 1, H)

    w_ih_f = jnp.concatenate([pad2(w_ih_g[g], Hp, Hp) for g in range(3)], axis=1)
    w_hh_f = jnp.concatenate([pad2(w_hh_g[g], Hp, Hp) for g in range(3)], axis=1)
    b_ih_f = jnp.concatenate([pad2(b_ih_g[g], 1, Hp) for g in range(3)], axis=1)
    b_hh_f = jnp.concatenate([pad2(b_hh_g[g], 1, Hp) for g in range(3)], axis=1)

    return {
        "H": int(H), "O": int(O), "Hp": int(Hp), "Op": int(Op),
        "emb":    pad2(emb, V, Hp).astype(jnp.bfloat16),         # (V, Hp)
        "w_ih_f": w_ih_f.astype(jnp.bfloat16),                   # (Hp, 3Hp)
        "w_hh_f": w_hh_f.astype(jnp.bfloat16),                   # (Hp, 3Hp)
        "b_ih_f": b_ih_f,                                        # (1, 3Hp) f32
        "b_hh_f": b_hh_f,                                        # (1, 3Hp) f32
        "w_dec":  pad2(raw["w_dec"].T, Hp, Op).astype(jnp.bfloat16),  # (Hp, Op)
        "b_dec":  pad2(raw["b_dec"].reshape(1, O), 1, Op),       # (1, Op) f32
    }


def rnn_decode(tokens, hidden, prep):
    """Run T recurrent steps in a single grid-less pallas_call.

    tokens : (T,) int32 token ids
    hidden : (n_layers=1, 1, H) f32
    returns (logits (T, O) f32, new_hidden (1, 1, H) f32)
    """
    H, O, Hp, Op = prep["H"], prep["O"], prep["Hp"], prep["Op"]
    T = int(tokens.shape[0])
    toks = tokens.astype(jnp.int32)

    # Embedding gather done in the wrapper (hoisted out of the recurrence).
    x_emb = jnp.take(prep["emb"], toks, axis=0)                  # (T, Hp) bf16
    h0 = jnp.zeros((1, Hp), jnp.float32)
    h0 = h0.at[:, :H].set(hidden.reshape(1, H).astype(jnp.float32))

    vmem = pl.BlockSpec(memory_space=pltpu.MemorySpace.VMEM)

    # NOTE: at spec-scale H this easily fits default scoped VMEM; for large
    # H/O set pltpu.CompilerParams(vmem_limit_bytes=...) here.
    logits_p, h_final_p = pl.pallas_call(
        _gru_decode_kernel,
        out_shape=(
            jax.ShapeDtypeStruct((T, Op), jnp.float32),
            jax.ShapeDtypeStruct((1, Hp), jnp.float32),
        ),
        in_specs=[vmem] * 8,
        out_specs=(vmem, vmem),
        scratch_shapes=[
            pltpu.VMEM((T, 3 * Hp), jnp.float32),   # Gi for all steps
            pltpu.VMEM((T, Hp), jnp.float32),       # hidden states for decoder
        ],
    )(x_emb, prep["w_ih_f"], prep["b_ih_f"], prep["w_hh_f"], prep["b_hh_f"],
      h0, prep["w_dec"], prep["b_dec"])

    return logits_p[:, :O], h_final_p[:, :H].reshape(1, 1, H)


def rnn_forward(tok, hidden, prep):
    """Single-token step matching RNN.forward(input, hidden) -> (logits, hidden)."""
    logits, h = rnn_decode(jnp.asarray(tok, jnp.int32).reshape(1), hidden, prep)
    return logits, h


def _reference_decode(tokens, hidden, raw):
    """Pure-JAX reference (PyTorch GRU semantics) mirroring the kernel's
    bf16-weight / f32-accumulate casts, computed on the unpadded shapes."""
    H = raw["w_hh"].shape[1]
    O = raw["w_dec"].shape[0]

    def bf(x):
        return jnp.asarray(x, jnp.float32).astype(jnp.bfloat16).astype(jnp.float32)

    emb = bf(raw["emb"])                  # (V, H)
    wih = bf(raw["w_ih"].T)               # (H, 3H) columns in r|z|n order
    whh = bf(raw["w_hh"].T)
    bih = raw["b_ih"].reshape(1, 3 * H).astype(jnp.float32)
    bhh = raw["b_hh"].reshape(1, 3 * H).astype(jnp.float32)
    wdec = bf(raw["w_dec"].T)             # (H, O)
    bdec = raw["b_dec"].reshape(1, O).astype(jnp.float32)

    h = hidden.reshape(1, H).astype(jnp.float32)
    outs = []
    for t in range(int(tokens.shape[0])):
        x = emb[tokens[t]].reshape(1, H)
        gi = x @ wih + bih
        gh = bf(h) @ whh + bhh
        r = jax.nn.sigmoid(gi[:, 0:H] + gh[:, 0:H])
        z = jax.nn.sigmoid(gi[:, H:2 * H] + gh[:, H:2 * H])
        n = jnp.tanh(gi[:, 2 * H:3 * H] + r * gh[:, 2 * H:3 * H])
        h = (1.0 - z) * n + z * h
        outs.append(bf(h) @ wdec + bdec)
    return jnp.concatenate(outs, axis=0), h.reshape(1, 1, H)


if __name__ == "__main__":
    # Spec configuration: hidden_size = 100, n_layers = 1.  Non-128 sizes are
    # zero-padded to lane width inside prepare_params().
    vocab_size = 100      # input_size
    hidden_size = 100     # hidden_size (spec default)
    output_size = 100     # output_size
    n_layers = 1
    T = 8                 # decode this many tokens in one kernel call

    key = jax.random.PRNGKey(0)
    ks = jax.random.split(key, 8)
    raw = {
        "emb":   0.1 * jax.random.normal(ks[0], (vocab_size, hidden_size), jnp.float32),
        "w_ih":  0.1 * jax.random.normal(ks[1], (3 * hidden_size, hidden_size), jnp.float32),
        "w_hh":  0.1 * jax.random.normal(ks[2], (3 * hidden_size, hidden_size), jnp.float32),
        "b_ih":  0.1 * jax.random.normal(ks[3], (3 * hidden_size,), jnp.float32),
        "b_hh":  0.1 * jax.random.normal(ks[4], (3 * hidden_size,), jnp.float32),
        "w_dec": 0.1 * jax.random.normal(ks[5], (output_size, hidden_size), jnp.float32),
        "b_dec": 0.1 * jax.random.normal(ks[6], (output_size,), jnp.float32),
    }
    prep = prepare_params(raw)            # one-time weight prep (hoisted)

    tokens = jax.random.randint(ks[7], (T,), 0, vocab_size, dtype=jnp.int32)
    hidden0 = jnp.zeros((n_layers, 1, hidden_size), jnp.float32)   # init_hidden()

    # Multi-token decode: the whole recurrence in one pallas_call.
    logits, new_hidden = rnn_decode(tokens, hidden0, prep)
    jax.block_until_ready((logits, new_hidden))

    ref_logits, ref_hidden = _reference_decode(tokens, hidden0, raw)
    np.testing.assert_allclose(np.asarray(logits), np.asarray(ref_logits),
                               rtol=5e-3, atol=5e-3)
    np.testing.assert_allclose(np.asarray(new_hidden), np.asarray(ref_hidden),
                               rtol=5e-3, atol=5e-3)

    # Single-token step matching the module's forward(input, hidden) signature.
    one_logits, one_hidden = rnn_forward(tokens[0], hidden0, prep)
    jax.block_until_ready((one_logits, one_hidden))
    ref1_logits, ref1_hidden = _reference_decode(tokens[:1], hidden0, raw)
    np.testing.assert_allclose(np.asarray(one_logits), np.asarray(ref1_logits),
                               rtol=5e-3, atol=5e-3)
    np.testing.assert_allclose(np.asarray(one_hidden), np.asarray(ref1_hidden),
                               rtol=5e-3, atol=5e-3)

    # TODO(synk): batching multiple decode streams (B, H) @ (H, 3H) would be the
    # next win on v6e/v7x (wider MXU rows / second TensorCore); single-stream
    # decode as specced by the module keeps M=1 on the recurrent matmul.

    print("KERNEL_OK")
</pallas_src>

<mosaic_0001>
module attributes {stable_mosaic.version = 11 : i64} {
  func.func @_gru_decode_kernel(%arg0: memref<8x128xbf16, #tpu.memory_space<vmem>>, %arg1: memref<128x384xbf16, #tpu.memory_space<vmem>>, %arg2: memref<1x384xf32, #tpu.memory_space<vmem>>, %arg3: memref<128x384xbf16, #tpu.memory_space<vmem>>, %arg4: memref<1x384xf32, #tpu.memory_space<vmem>>, %arg5: memref<1x128xf32, #tpu.memory_space<vmem>>, %arg6: memref<128x128xbf16, #tpu.memory_space<vmem>>, %arg7: memref<1x128xf32, #tpu.memory_space<vmem>>, %arg8: memref<8x128xf32, #tpu.memory_space<vmem>>, %arg9: memref<1x128xf32, #tpu.memory_space<vmem>>, %arg10: memref<8x384xf32, #tpu.memory_space<vmem>>, %arg11: memref<8x128xf32, #tpu.memory_space<vmem>>) attributes {dimension_semantics = [], scalar_prefetch = 0 : i64, scratch_operands = 2 : i64, tpu.core_type = #tpu.core_type<tc>} {
    %c0 = arith.constant 0 : index
    %c0_0 = arith.constant 0 : index
    %0 = vector.load %arg0[%c0, %c0_0] : memref<8x128xbf16, #tpu.memory_space<vmem>>, vector<8x128xbf16>
    %c0_1 = arith.constant 0 : index
    %c0_2 = arith.constant 0 : index
    %1 = vector.load %arg1[%c0_1, %c0_2] : memref<128x384xbf16, #tpu.memory_space<vmem>>, vector<128x384xbf16>
    %cst = arith.constant dense<0.000000e+00> : vector<8x384xf32>
    %2 = tpu.matmul %0, %1, %cst {dimension_numbers = #tpu.dot_dimension_numbers<[1], [0], [0], [1], [0, 0, 1, 1], [], []>} : vector<8x128xbf16>, vector<128x384xbf16>, vector<8x384xf32> -> vector<8x384xf32>
    %c0_3 = arith.constant 0 : index
    %c0_4 = arith.constant 0 : index
    %3 = vector.load %arg2[%c0_3, %c0_4] : memref<1x384xf32, #tpu.memory_space<vmem>>, vector<1x384xf32>
    %4 = vector.broadcast %3 : vector<1x384xf32> to vector<8x384xf32>
    %5 = arith.addf %2, %4 : vector<8x384xf32>
    %c0_5 = arith.constant 0 : index
    %c0_6 = arith.constant 0 : index
    %6 = vector.load %arg10[%c0_5, %c0_6] : memref<8x384xf32, #tpu.memory_space<vmem>>, vector<8x384xf32>
    tpu.vector_store %arg10[%c0_5, %c0_6], %5 {strides = array<i32>} : memref<8x384xf32, #tpu.memory_space<vmem>>, vector<8x384xf32>,
    %c0_7 = arith.constant 0 : index
    %c0_8 = arith.constant 0 : index
    %7 = vector.load %arg3[%c0_7, %c0_8] : memref<128x384xbf16, #tpu.memory_space<vmem>>, vector<128x384xbf16>
    %c0_9 = arith.constant 0 : index
    %c0_10 = arith.constant 0 : index
    %8 = vector.load %arg4[%c0_9, %c0_10] : memref<1x384xf32, #tpu.memory_space<vmem>>, vector<1x384xf32>
    %c0_11 = arith.constant 0 : index
    %c0_12 = arith.constant 0 : index
    %9 = vector.load %arg5[%c0_11, %c0_12] : memref<1x128xf32, #tpu.memory_space<vmem>>, vector<1x128xf32>
    %c0_i32 = arith.constant 0 : i32
    %10 = arith.index_cast %c0_i32 : i32 to index
    %c0_13 = arith.constant 0 : index
    %11 = vector.load %arg10[%10, %c0_13] : memref<8x384xf32, #tpu.memory_space<vmem>>, vector<1x384xf32>
    %12 = arith.truncf %9 : vector<1x128xf32> to vector<1x128xbf16>
    %cst_14 = arith.constant dense<0.000000e+00> : vector<1x384xf32>
    %13 = tpu.matmul %12, %7, %cst_14 {dimension_numbers = #tpu.dot_dimension_numbers<[1], [0], [0], [1], [0, 0, 1, 1], [], []>} : vector<1x128xbf16>, vector<128x384xbf16>, vector<1x384xf32> -> vector<1x384xf32>
    %14 = arith.addf %13, %8 : vector<1x384xf32>
    %15 = vector.extract_strided_slice %11 {offsets = [0, 0], sizes = [1, 128], strides = [1, 1]} : vector<1x384xf32> to vector<1x128xf32>
    %16 = vector.extract_strided_slice %14 {offsets = [0, 0], sizes = [1, 128], strides = [1, 1]} : vector<1x384xf32> to vector<1x128xf32>
    %17 = arith.addf %15, %16 : vector<1x128xf32>
    %18 = arith.negf %17 : vector<1x128xf32>
    %19 = math.exp %18 : vector<1x128xf32>
    %cst_15 = arith.constant 1.000000e+00 : f32
    %20 = vector.broadcast %cst_15 : f32 to vector<1x128xf32>
    %21 = arith.addf %20, %19 : vector<1x128xf32>
    %22 = arith.divf %20, %21 : vector<1x128xf32>
    %23 = vector.extract_strided_slice %11 {offsets = [0, 128], sizes = [1, 128], strides = [1, 1]} : vector<1x384xf32> to vector<1x128xf32>
    %24 = vector.extract_strided_slice %14 {offsets = [0, 128], sizes = [1, 128], strides = [1, 1]} : vector<1x384xf32> to vector<1x128xf32>
    %25 = arith.addf %23, %24 : vector<1x128xf32>
    %26 = arith.negf %25 : vector<1x128xf32>
    %27 = math.exp %26 : vector<1x128xf32>
    %cst_16 = arith.constant 1.000000e+00 : f32
    %28 = vector.broadcast %cst_16 : f32 to vector<1x128xf32>
    %29 = arith.addf %28, %27 : vector<1x128xf32>
    %30 = arith.divf %28, %29 : vector<1x128xf32>
    %31 = vector.extract_strided_slice %11 {offsets = [0, 256], sizes = [1, 128], strides = [1, 1]} : vector<1x384xf32> to vector<1x128xf32>
    %32 = vector.extract_strided_slice %14 {offsets = [0, 256], sizes = [1, 128], strides = [1, 1]} : vector<1x384xf32> to vector<1x128xf32>
    %33 = arith.mulf %22, %32 : vector<1x128xf32>
    %34 = arith.addf %31, %33 : vector<1x128xf32>
    %35 = math.tanh %34 : vector<1x128xf32>
    %cst_17 = arith.constant 1.000000e+00 : f32
    %36 = vector.broadcast %cst_17 : f32 to vector<1x128xf32>
    %37 = arith.subf %36, %30 : vector<1x128xf32>
    %38 = arith.mulf %37, %35 : vector<1x128xf32>
    %39 = arith.mulf %30, %9 : vector<1x128xf32>
    %40 = arith.addf %38, %39 : vector<1x128xf32>
    %41 = arith.index_cast %c0_i32 : i32 to index
    %c0_18 = arith.constant 0 : index
    %42 = vector.load %arg11[%41, %c0_18] : memref<8x128xf32, #tpu.memory_space<vmem>>, vector<1x128xf32>
    tpu.vector_store %arg11[%41, %c0_18], %40 {strides = array<i32>} : memref<8x128xf32, #tpu.memory_space<vmem>>, vector<1x128xf32>,
    %c1_i32 = arith.constant 1 : i32
    %43 = arith.index_cast %c1_i32 : i32 to index
    %c0_19 = arith.constant 0 : index
    %44 = vector.load %arg10[%43, %c0_19] : memref<8x384xf32, #tpu.memory_space<vmem>>, vector<1x384xf32>
    %45 = arith.truncf %40 : vector<1x128xf32> to vector<1x128xbf16>
    %cst_20 = arith.constant dense<0.000000e+00> : vector<1x384xf32>
    %46 = tpu.matmul %45, %7, %cst_20 {dimension_numbers = #tpu.dot_dimension_numbers<[1], [0], [0], [1], [0, 0, 1, 1], [], []>} : vector<1x128xbf16>, vector<128x384xbf16>, vector<1x384xf32> -> vector<1x384xf32>
    %47 = arith.addf %46, %8 : vector<1x384xf32>
    %48 = vector.extract_strided_slice %44 {offsets = [0, 0], sizes = [1, 128], strides = [1, 1]} : vector<1x384xf32> to vector<1x128xf32>
    %49 = vector.extract_strided_slice %47 {offsets = [0, 0], sizes = [1, 128], strides = [1, 1]} : vector<1x384xf32> to vector<1x128xf32>
    %50 = arith.addf %48, %49 : vector<1x128xf32>
    %51 = arith.negf %50 : vector<1x128xf32>
    %52 = math.exp %51 : vector<1x128xf32>
    %cst_21 = arith.constant 1.000000e+00 : f32
    %53 = vector.broadcast %cst_21 : f32 to vector<1x128xf32>
    %54 = arith.addf %53, %52 : vector<1x128xf32>
    %55 = arith.divf %53, %54 : vector<1x128xf32>
    %56 = vector.extract_strided_slice %44 {offsets = [0, 128], sizes = [1, 128], strides = [1, 1]} : vector<1x384xf32> to vector<1x128xf32>
    %57 = vector.extract_strided_slice %47 {offsets = [0, 128], sizes = [1, 128], strides = [1, 1]} : vector<1x384xf32> to vector<1x128xf32>
    %58 = arith.addf %56, %57 : vector<1x128xf32>
    %59 = arith.negf %58 : vector<1x128xf32>
    %60 = math.exp %59 : vector<1x128xf32>
    %cst_22 = arith.constant 1.000000e+00 : f32
    %61 = vector.broadcast %cst_22 : f32 to vector<1x128xf32>
    %62 = arith.addf %61, %60 : vector<1x128xf32>
    %63 = arith.divf %61, %62 : vector<1x128xf32>
    %64 = vector.extract_strided_slice %44 {offsets = [0, 256], sizes = [1, 128], strides = [1, 1]} : vector<1x384xf32> to vector<1x128xf32>
    %65 = vector.extract_strided_slice %47 {offsets = [0, 256], sizes = [1, 128], strides = [1, 1]} : vector<1x384xf32> to vector<1x128xf32>
    %66 = arith.mulf %55, %65 : vector<1x128xf32>
    %67 = arith.addf %64, %66 : vector<1x128xf32>
    %68 = math.tanh %67 : vector<1x128xf32>
    %cst_23 = arith.constant 1.000000e+00 : f32
    %69 = vector.broadcast %cst_23 : f32 to vector<1x128xf32>
    %70 = arith.subf %69, %63 : vector<1x128xf32>
    %71 = arith.mulf %70, %68 : vector<1x128xf32>
    %72 = arith.mulf %63, %40 : vector<1x128xf32>
    %73 = arith.addf %71, %72 : vector<1x128xf32>
    %74 = arith.index_cast %c1_i32 : i32 to index
    %c0_24 = arith.constant 0 : index
    %75 = vector.load %arg11[%74, %c0_24] : memref<8x128xf32, #tpu.memory_space<vmem>>, vector<1x128xf32>
    tpu.vector_store %arg11[%74, %c0_24], %73 {strides = array<i32>} : memref<8x128xf32, #tpu.memory_space<vmem>>, vector<1x128xf32>,
    %c2_i32 = arith.constant 2 : i32
    %76 = arith.index_cast %c2_i32 : i32 to index
    %c0_25 = arith.constant 0 : index
    %77 = vector.load %arg10[%76, %c0_25] : memref<8x384xf32, #tpu.memory_space<vmem>>, vector<1x384xf32>
    %78 = arith.truncf %73 : vector<1x128xf32> to vector<1x128xbf16>
    %cst_26 = arith.constant dense<0.000000e+00> : vector<1x384xf32>
    %79 = tpu.matmul %78, %7, %cst_26 {dimension_numbers = #tpu.dot_dimension_numbers<[1], [0], [0], [1], [0, 0, 1, 1], [], []>} : vector<1x128xbf16>, vector<128x384xbf16>, vector<1x384xf32> -> vector<1x384xf32>
    %80 = arith.addf %79, %8 : vector<1x384xf32>
    %81 = vector.extract_strided_slice %77 {offsets = [0, 0], sizes = [1, 128], strides = [1, 1]} : vector<1x384xf32> to vector<1x128xf32>
    %82 = vector.extract_strided_slice %80 {offsets = [0, 0], sizes = [1, 128], strides = [1, 1]} : vector<1x384xf32> to vector<1x128xf32>
    %83 = arith.addf %81, %82 : vector<1x128xf32>
    %84 = arith.negf %83 : vector<1x128xf32>
    %85 = math.exp %84 : vector<1x128xf32>
    %cst_27 = arith.constant 1.000000e+00 : f32
    %86 = vector.broadcast %cst_27 : f32 to vector<1x128xf32>
    %87 = arith.addf %86, %85 : vector<1x128xf32>
    %88 = arith.divf %86, %87 : vector<1x128xf32>
    %89 = vector.extract_strided_slice %77 {offsets = [0, 128], sizes = [1, 128], strides = [1, 1]} : vector<1x384xf32> to vector<1x128xf32>
    %90 = vector.extract_strided_slice %80 {offsets = [0, 128], sizes = [1, 128], strides = [1, 1]} : vector<1x384xf32> to vector<1x128xf32>
    %91 = arith.addf %89, %90 : vector<1x128xf32>
    %92 = arith.negf %91 : vector<1x128xf32>
    %93 = math.exp %92 : vector<1x128xf32>
    %cst_28 = arith.constant 1.000000e+00 : f32
    %94 = vector.broadcast %cst_28 : f32 to vector<1x128xf32>
    %95 = arith.addf %94, %93 : vector<1x128xf32>
    %96 = arith.divf %94, %95 : vector<1x128xf32>
    %97 = vector.extract_strided_slice %77 {offsets = [0, 256], sizes = [1, 128], strides = [1, 1]} : vector<1x384xf32> to vector<1x128xf32>
    %98 = vector.extract_strided_slice %80 {offsets = [0, 256], sizes = [1, 128], strides = [1, 1]} : vector<1x384xf32> to vector<1x128xf32>
    %99 = arith.mulf %88, %98 : vector<1x128xf32>
    %100 = arith.addf %97, %99 : vector<1x128xf32>
    %101 = math.tanh %100 : vector<1x128xf32>
    %cst_29 = arith.constant 1.000000e+00 : f32
    %102 = vector.broadcast %cst_29 : f32 to vector<1x128xf32>
    %103 = arith.subf %102, %96 : vector<1x128xf32>
    %104 = arith.mulf %103, %101 : vector<1x128xf32>
    %105 = arith.mulf %96, %73 : vector<1x128xf32>
    %106 = arith.addf %104, %105 : vector<1x128xf32>
    %107 = arith.index_cast %c2_i32 : i32 to index
    %c0_30 = arith.constant 0 : index
    %108 = vector.load %arg11[%107, %c0_30] : memref<8x128xf32, #tpu.memory_space<vmem>>, vector<1x128xf32>
    tpu.vector_store %arg11[%107, %c0_30], %106 {strides = array<i32>} : memref<8x128xf32, #tpu.memory_space<vmem>>, vector<1x128xf32>,
    %c3_i32 = arith.constant 3 : i32
    %109 = arith.index_cast %c3_i32 : i32 to index
    %c0_31 = arith.constant 0 : index
    %110 = vector.load %arg10[%109, %c0_31] : memref<8x384xf32, #tpu.memory_space<vmem>>, vector<1x384xf32>
    %111 = arith.truncf %106 : vector<1x128xf32> to vector<1x128xbf16>
    %cst_32 = arith.constant dense<0.000000e+00> : vector<1x384xf32>
    %112 = tpu.matmul %111, %7, %cst_32 {dimension_numbers = #tpu.dot_dimension_numbers<[1], [0], [0], [1], [0, 0, 1, 1], [], []>} : vector<1x128xbf16>, vector<128x384xbf16>, vector<1x384xf32> -> vector<1x384xf32>
    %113 = arith.addf %112, %8 : vector<1x384xf32>
    %114 = vector.extract_strided_slice %110 {offsets = [0, 0], sizes = [1, 128], strides = [1, 1]} : vector<1x384xf32> to vector<1x128xf32>
    %115 = vector.extract_strided_slice %113 {offsets = [0, 0], sizes = [1, 128], strides = [1, 1]} : vector<1x384xf32> to vector<1x128xf32>
    %116 = arith.addf %114, %115 : vector<1x128xf32>
    %117 = arith.negf %116 : vector<1x128xf32>
    %118 = math.exp %117 : vector<1x128xf32>
    %cst_33 = arith.constant 1.000000e+00 : f32
    %119 = vector.broadcast %cst_33 : f32 to vector<1x128xf32>
    %120 = arith.addf %119, %118 : vector<1x128xf32>
    %121 = arith.divf %119, %120 : vector<1x128xf32>
    %122 = vector.extract_strided_slice %110 {offsets = [0, 128], sizes = [1, 128], strides = [1, 1]} : vector<1x384xf32> to vector<1x128xf32>
    %123 = vector.extract_strided_slice %113 {offsets = [0, 128], sizes = [1, 128], strides = [1, 1]} : vector<1x384xf32> to vector<1x128xf32>
    %124 = arith.addf %122, %123 : vector<1x128xf32>
    %125 = arith.negf %124 : vector<1x128xf32>
    %126 = math.exp %125 : vector<1x128xf32>
    %cst_34 = arith.constant 1.000000e+00 : f32
    %127 = vector.broadcast %cst_34 : f32 to vector<1x128xf32>
    %128 = arith.addf %127, %126 : vector<1x128xf32>
    %129 = arith.divf %127, %128 : vector<1x128xf32>
    %130 = vector.extract_strided_slice %110 {offsets = [0, 256], sizes = [1, 128], strides = [1, 1]} : vector<1x384xf32> to vector<1x128xf32>
    %131 = vector.extract_strided_slice %113 {offsets = [0, 256], sizes = [1, 128], strides = [1, 1]} : vector<1x384xf32> to vector<1x128xf32>
    %132 = arith.mulf %121, %131 : vector<1x128xf32>
    %133 = arith.addf %130, %132 : vector<1x128xf32>
    %134 = math.tanh %133 : vector<1x128xf32>
    %cst_35 = arith.constant 1.000000e+00 : f32
    %135 = vector.broadcast %cst_35 : f32 to vector<1x128xf32>
    %136 = arith.subf %135, %129 : vector<1x128xf32>
    %137 = arith.mulf %136, %134 : vector<1x128xf32>
    %138 = arith.mulf %129, %106 : vector<1x128xf32>
    %139 = arith.addf %137, %138 : vector<1x128xf32>
    %140 = arith.index_cast %c3_i32 : i32 to index
    %c0_36 = arith.constant 0 : index
    %141 = vector.load %arg11[%140, %c0_36] : memref<8x128xf32, #tpu.memory_space<vmem>>, vector<1x128xf32>
    tpu.vector_store %arg11[%140, %c0_36], %139 {strides = array<i32>} : memref<8x128xf32, #tpu.memory_space<vmem>>, vector<1x128xf32>,
    %c4_i32 = arith.constant 4 : i32
    %142 = arith.index_cast %c4_i32 : i32 to index
    %c0_37 = arith.constant 0 : index
    %143 = vector.load %arg10[%142, %c0_37] : memref<8x384xf32, #tpu.memory_space<vmem>>, vector<1x384xf32>
    %144 = arith.truncf %139 : vector<1x128xf32> to vector<1x128xbf16>
    %cst_38 = arith.constant dense<0.000000e+00> : vector<1x384xf32>
    %145 = tpu.matmul %144, %7, %cst_38 {dimension_numbers = #tpu.dot_dimension_numbers<[1], [0], [0], [1], [0, 0, 1, 1], [], []>} : vector<1x128xbf16>, vector<128x384xbf16>, vector<1x384xf32> -> vector<1x384xf32>
    %146 = arith.addf %145, %8 : vector<1x384xf32>
    %147 = vector.extract_strided_slice %143 {offsets = [0, 0], sizes = [1, 128], strides = [1, 1]} : vector<1x384xf32> to vector<1x128xf32>
    %148 = vector.extract_strided_slice %146 {offsets = [0, 0], sizes = [1, 128], strides = [1, 1]} : vector<1x384xf32> to vector<1x128xf32>
    %149 = arith.addf %147, %148 : vector<1x128xf32>
    %150 = arith.negf %149 : vector<1x128xf32>
    %151 = math.exp %150 : vector<1x128xf32>
    %cst_39 = arith.constant 1.000000e+00 : f32
    %152 = vector.broadcast %cst_39 : f32 to vector<1x128xf32>
    %153 = arith.addf %152, %151 : vector<1x128xf32>
    %154 = arith.divf %152, %153 : vector<1x128xf32>
    %155 = vector.extract_strided_slice %143 {offsets = [0, 128], sizes = [1, 128], strides = [1, 1]} : vector<1x384xf32> to vector<1x128xf32>
    %156 = vector.extract_strided_slice %146 {offsets = [0, 128], sizes = [1, 128], strides = [1, 1]} : vector<1x384xf32> to vector<1x128xf32>
    %157 = arith.addf %155, %156 : vector<1x128xf32>
    %158 = arith.negf %157 : vector<1x128xf32>
    %159 = math.exp %158 : vector<1x128xf32>
    %cst_40 = arith.constant 1.000000e+00 : f32
    %160 = vector.broadcast %cst_40 : f32 to vector<1x128xf32>
    %161 = arith.addf %160, %159 : vector<1x128xf32>
    %162 = arith.divf %160, %161 : vector<1x128xf32>
    %163 = vector.extract_strided_slice %143 {offsets = [0, 256], sizes = [1, 128], strides = [1, 1]} : vector<1x384xf32> to vector<1x128xf32>
    %164 = vector.extract_strided_slice %146 {offsets = [0, 256], sizes = [1, 128], strides = [1, 1]} : vector<1x384xf32> to vector<1x128xf32>
    %165 = arith.mulf %154, %164 : vector<1x128xf32>
    %166 = arith.addf %163, %165 : vector<1x128xf32>
    %167 = math.tanh %166 : vector<1x128xf32>
    %cst_41 = arith.constant 1.000000e+00 : f32
    %168 = vector.broadcast %cst_41 : f32 to vector<1x128xf32>
    %169 = arith.subf %168, %162 : vector<1x128xf32>
    %170 = arith.mulf %169, %167 : vector<1x128xf32>
    %171 = arith.mulf %162, %139 : vector<1x128xf32>
    %172 = arith.addf %170, %171 : vector<1x128xf32>
    %173 = arith.index_cast %c4_i32 : i32 to index
    %c0_42 = arith.constant 0 : index
    %174 = vector.load %arg11[%173, %c0_42] : memref<8x128xf32, #tpu.memory_space<vmem>>, vector<1x128xf32>
    tpu.vector_store %arg11[%173, %c0_42], %172 {strides = array<i32>} : memref<8x128xf32, #tpu.memory_space<vmem>>, vector<1x128xf32>,
    %c5_i32 = arith.constant 5 : i32
    %175 = arith.index_cast %c5_i32 : i32 to index
    %c0_43 = arith.constant 0 : index
    %176 = vector.load %arg10[%175, %c0_43] : memref<8x384xf32, #tpu.memory_space<vmem>>, vector<1x384xf32>
    %177 = arith.truncf %172 : vector<1x128xf32> to vector<1x128xbf16>
    %cst_44 = arith.constant dense<0.000000e+00> : vector<1x384xf32>
    %178 = tpu.matmul %177, %7, %cst_44 {dimension_numbers = #tpu.dot_dimension_numbers<[1], [0], [0], [1], [0, 0, 1, 1], [], []>} : vector<1x128xbf16>, vector<128x384xbf16>, vector<1x384xf32> -> vector<1x384xf32>
    %179 = arith.addf %178, %8 : vector<1x384xf32>
    %180 = vector.extract_strided_slice %176 {offsets = [0, 0], sizes = [1, 128], strides = [1, 1]} : vector<1x384xf32> to vector<1x128xf32>
    %181 = vector.extract_strided_slice %179 {offsets = [0, 0], sizes = [1, 128], strides = [1, 1]} : vector<1x384xf32> to vector<1x128xf32>
    %182 = arith.addf %180, %181 : vector<1x128xf32>
    %183 = arith.negf %182 : vector<1x128xf32>
    %184 = math.exp %183 : vector<1x128xf32>
    %cst_45 = arith.constant 1.000000e+00 : f32
    %185 = vector.broadcast %cst_45 : f32 to vector<1x128xf32>
    %186 = arith.addf %185, %184 : vector<1x128xf32>
    %187 = arith.divf %185, %186 : vector<1x128xf32>
    %188 = vector.extract_strided_slice %176 {offsets = [0, 128], sizes = [1, 128], strides = [1, 1]} : vector<1x384xf32> to vector<1x128xf32>
    %189 = vector.extract_strided_slice %179 {offsets = [0, 128], sizes = [1, 128], strides = [1, 1]} : vector<1x384xf32> to vector<1x128xf32>
    %190 = arith.addf %188, %189 : vector<1x128xf32>
    %191 = arith.negf %190 : vector<1x128xf32>
    %192 = math.exp %191 : vector<1x128xf32>
    %cst_46 = arith.constant 1.000000e+00 : f32
    %193 = vector.broadcast %cst_46 : f32 to vector<1x128xf32>
    %194 = arith.addf %193, %192 : vector<1x128xf32>
    %195 = arith.divf %193, %194 : vector<1x128xf32>
    %196 = vector.extract_strided_slice %176 {offsets = [0, 256], sizes = [1, 128], strides = [1, 1]} : vector<1x384xf32> to vector<1x128xf32>
    %197 = vector.extract_strided_slice %179 {offsets = [0, 256], sizes = [1, 128], strides = [1, 1]} : vector<1x384xf32> to vector<1x128xf32>
    %198 = arith.mulf %187, %197 : vector<1x128xf32>
    %199 = arith.addf %196, %198 : vector<1x128xf32>
    %200 = math.tanh %199 : vector<1x128xf32>
    %cst_47 = arith.constant 1.000000e+00 : f32
    %201 = vector.broadcast %cst_47 : f32 to vector<1x128xf32>
    %202 = arith.subf %201, %195 : vector<1x128xf32>
    %203 = arith.mulf %202, %200 : vector<1x128xf32>
    %204 = arith.mulf %195, %172 : vector<1x128xf32>
    %205 = arith.addf %203, %204 : vector<1x128xf32>
    %206 = arith.index_cast %c5_i32 : i32 to index
    %c0_48 = arith.constant 0 : index
    %207 = vector.load %arg11[%206, %c0_48] : memref<8x128xf32, #tpu.memory_space<vmem>>, vector<1x128xf32>
    tpu.vector_store %arg11[%206, %c0_48], %205 {strides = array<i32>} : memref<8x128xf32, #tpu.memory_space<vmem>>, vector<1x128xf32>,
    %c6_i32 = arith.constant 6 : i32
    %208 = arith.index_cast %c6_i32 : i32 to index
    %c0_49 = arith.constant 0 : index
    %209 = vector.load %arg10[%208, %c0_49] : memref<8x384xf32, #tpu.memory_space<vmem>>, vector<1x384xf32>
    %210 = arith.truncf %205 : vector<1x128xf32> to vector<1x128xbf16>
    %cst_50 = arith.constant dense<0.000000e+00> : vector<1x384xf32>
    %211 = tpu.matmul %210, %7, %cst_50 {dimension_numbers = #tpu.dot_dimension_numbers<[1], [0], [0], [1], [0, 0, 1, 1], [], []>} : vector<1x128xbf16>, vector<128x384xbf16>, vector<1x384xf32> -> vector<1x384xf32>
    %212 = arith.addf %211, %8 : vector<1x384xf32>
    %213 = vector.extract_strided_slice %209 {offsets = [0, 0], sizes = [1, 128], strides = [1, 1]} : vector<1x384xf32> to vector<1x128xf32>
    %214 = vector.extract_strided_slice %212 {offsets = [0, 0], sizes = [1, 128], strides = [1, 1]} : vector<1x384xf32> to vector<1x128xf32>
    %215 = arith.addf %213, %214 : vector<1x128xf32>
    %216 = arith.negf %215 : vector<1x128xf32>
    %217 = math.exp %216 : vector<1x128xf32>
    %cst_51 = arith.constant 1.000000e+00 : f32
    %218 = vector.broadcast %cst_51 : f32 to vector<1x128xf32>
    %219 = arith.addf %218, %217 : vector<1x128xf32>
    %220 = arith.divf %218, %219 : vector<1x128xf32>
    %221 = vector.extract_strided_slice %209 {offsets = [0, 128], sizes = [1, 128], strides = [1, 1]} : vector<1x384xf32> to vector<1x128xf32>
    %222 = vector.extract_strided_slice %212 {offsets = [0, 128], sizes = [1, 128], strides = [1, 1]} : vector<1x384xf32> to vector<1x128xf32>
    %223 = arith.addf %221, %222 : vector<1x128xf32>
    %224 = arith.negf %223 : vector<1x128xf32>
    %225 = math.exp %224 : vector<1x128xf32>
    %cst_52 = arith.constant 1.000000e+00 : f32
    %226 = vector.broadcast %cst_52 : f32 to vector<1x128xf32>
    %227 = arith.addf %226, %225 : vector<1x128xf32>
    %228 = arith.divf %226, %227 : vector<1x128xf32>
    %229 = vector.extract_strided_slice %209 {offsets = [0, 256], sizes = [1, 128], strides = [1, 1]} : vector<1x384xf32> to vector<1x128xf32>
    %230 = vector.extract_strided_slice %212 {offsets = [0, 256], sizes = [1, 128], strides = [1, 1]} : vector<1x384xf32> to vector<1x128xf32>
    %231 = arith.mulf %220, %230 : vector<1x128xf32>
    %232 = arith.addf %229, %231 : vector<1x128xf32>
    %233 = math.tanh %232 : vector<1x128xf32>
    %cst_53 = arith.constant 1.000000e+00 : f32
    %234 = vector.broadcast %cst_53 : f32 to vector<1x128xf32>
    %235 = arith.subf %234, %228 : vector<1x128xf32>
    %236 = arith.mulf %235, %233 : vector<1x128xf32>
    %237 = arith.mulf %228, %205 : vector<1x128xf32>
    %238 = arith.addf %236, %237 : vector<1x128xf32>
    %239 = arith.index_cast %c6_i32 : i32 to index
    %c0_54 = arith.constant 0 : index
    %240 = vector.load %arg11[%239, %c0_54] : memref<8x128xf32, #tpu.memory_space<vmem>>, vector<1x128xf32>
    tpu.vector_store %arg11[%239, %c0_54], %238 {strides = array<i32>} : memref<8x128xf32, #tpu.memory_space<vmem>>, vector<1x128xf32>,
    %c7_i32 = arith.constant 7 : i32
    %241 = arith.index_cast %c7_i32 : i32 to index
    %c0_55 = arith.constant 0 : index
    %242 = vector.load %arg10[%241, %c0_55] : memref<8x384xf32, #tpu.memory_space<vmem>>, vector<1x384xf32>
    %243 = arith.truncf %238 : vector<1x128xf32> to vector<1x128xbf16>
    %cst_56 = arith.constant dense<0.000000e+00> : vector<1x384xf32>
    %244 = tpu.matmul %243, %7, %cst_56 {dimension_numbers = #tpu.dot_dimension_numbers<[1], [0], [0], [1], [0, 0, 1, 1], [], []>} : vector<1x128xbf16>, vector<128x384xbf16>, vector<1x384xf32> -> vector<1x384xf32>
    %245 = arith.addf %244, %8 : vector<1x384xf32>
    %246 = vector.extract_strided_slice %242 {offsets = [0, 0], sizes = [1, 128], strides = [1, 1]} : vector<1x384xf32> to vector<1x128xf32>
    %247 = vector.extract_strided_slice %245 {offsets = [0, 0], sizes = [1, 128], strides = [1, 1]} : vector<1x384xf32> to vector<1x128xf32>
    %248 = arith.addf %246, %247 : vector<1x128xf32>
    %249 = arith.negf %248 : vector<1x128xf32>
    %250 = math.exp %249 : vector<1x128xf32>
    %cst_57 = arith.constant 1.000000e+00 : f32
    %251 = vector.broadcast %cst_57 : f32 to vector<1x128xf32>
    %252 = arith.addf %251, %250 : vector<1x128xf32>
    %253 = arith.divf %251, %252 : vector<1x128xf32>
    %254 = vector.extract_strided_slice %242 {offsets = [0, 128], sizes = [1, 128], strides = [1, 1]} : vector<1x384xf32> to vector<1x128xf32>
    %255 = vector.extract_strided_slice %245 {offsets = [0, 128], sizes = [1, 128], strides = [1, 1]} : vector<1x384xf32> to vector<1x128xf32>
    %256 = arith.addf %254, %255 : vector<1x128xf32>
    %257 = arith.negf %256 : vector<1x128xf32>
    %258 = math.exp %257 : vector<1x128xf32>
    %cst_58 = arith.constant 1.000000e+00 : f32
    %259 = vector.broadcast %cst_58 : f32 to vector<1x128xf32>
    %260 = arith.addf %259, %258 : vector<1x128xf32>
    %261 = arith.divf %259, %260 : vector<1x128xf32>
    %262 = vector.extract_strided_slice %242 {offsets = [0, 256], sizes = [1, 128], strides = [1, 1]} : vector<1x384xf32> to vector<1x128xf32>
    %263 = vector.extract_strided_slice %245 {offsets = [0, 256], sizes = [1, 128], strides = [1, 1]} : vector<1x384xf32> to vector<1x128xf32>
    %264 = arith.mulf %253, %263 : vector<1x128xf32>
    %265 = arith.addf %262, %264 : vector<1x128xf32>
    %266 = math.tanh %265 : vector<1x128xf32>
    %cst_59 = arith.constant 1.000000e+00 : f32
    %267 = vector.broadcast %cst_59 : f32 to vector<1x128xf32>
    %268 = arith.subf %267, %261 : vector<1x128xf32>
    %269 = arith.mulf %268, %266 : vector<1x128xf32>
    %270 = arith.mulf %261, %238 : vector<1x128xf32>
    %271 = arith.addf %269, %270 : vector<1x128xf32>
    %272 = arith.index_cast %c7_i32 : i32 to index
    %c0_60 = arith.constant 0 : index
    %273 = vector.load %arg11[%272, %c0_60] : memref<8x128xf32, #tpu.memory_space<vmem>>, vector<1x128xf32>
    tpu.vector_store %arg11[%272, %c0_60], %271 {strides = array<i32>} : memref<8x128xf32, #tpu.memory_space<vmem>>, vector<1x128xf32>,
    %c8_i32 = arith.constant 8 : i32
    %c0_61 = arith.constant 0 : index
    %c0_62 = arith.constant 0 : index
    %274 = vector.load %arg9[%c0_61, %c0_62] : memref<1x128xf32, #tpu.memory_space<vmem>>, vector<1x128xf32>
    tpu.vector_store %arg9[%c0_61, %c0_62], %271 {strides = array<i32>} : memref<1x128xf32, #tpu.memory_space<vmem>>, vector<1x128xf32>,
    %c0_63 = arith.constant 0 : index
    %c0_64 = arith.constant 0 : index
    %275 = vector.load %arg11[%c0_63, %c0_64] : memref<8x128xf32, #tpu.memory_space<vmem>>, vector<8x128xf32>
    %276 = arith.truncf %275 : vector<8x128xf32> to vector<8x128xbf16>
    %c0_65 = arith.constant 0 : index
    %c0_66 = arith.constant 0 : index
    %277 = vector.load %arg6[%c0_65, %c0_66] : memref<128x128xbf16, #tpu.memory_space<vmem>>, vector<128x128xbf16>
    %cst_67 = arith.constant dense<0.000000e+00> : vector<8x128xf32>
    %278 = tpu.matmul %276, %277, %cst_67 {dimension_numbers = #tpu.dot_dimension_numbers<[1], [0], [0], [1], [0, 0, 1, 1], [], []>} : vector<8x128xbf16>, vector<128x128xbf16>, vector<8x128xf32> -> vector<8x128xf32>
    %c0_68 = arith.constant 0 : index
    %c0_69 = arith.constant 0 : index
    %279 = vector.load %arg7[%c0_68, %c0_69] : memref<1x128xf32, #tpu.memory_space<vmem>>, vector<1x128xf32>
    %280 = vector.broadcast %279 : vector<1x128xf32> to vector<8x128xf32>
    %281 = arith.addf %278, %280 : vector<8x128xf32>
    %c0_70 = arith.constant 0 : index
    %c0_71 = arith.constant 0 : index
    %282 = vector.load %arg8[%c0_70, %c0_71] : memref<8x128xf32, #tpu.memory_space<vmem>>, vector<8x128xf32>
    tpu.vector_store %arg8[%c0_70, %c0_71], %281 {strides = array<i32>} : memref<8x128xf32, #tpu.memory_space<vmem>>, vector<8x128xf32>,
    return
  }
}

</mosaic_0001>

<bundles_post_ra>
// kernel: tpu_custom_call.1
= control target key start
LH: loop header
LB: loop body
LE: loop exit
PB: predicated region body
PF: predicated region fallthrough
CT: control target
= control target key end

     0   :  { %15 = vsyncpa [#allocation5], 0  ;;  %s2737_s0 = inlined_call_operand.hbm [shape: bf16[8,128], index: 0, kind: input, shape index: {}]   ;;  %s2738_s1 = inlined_call_operand.hbm [shape: bf16[128,384], index: 1, kind: input, shape index: {}]   ;;  %s2739_s2 = inlined_call_operand.vmem [shape: f32[1,384], index: 2, kind: input, shape index: {}]   ;;  %s2740_s3 = inlined_call_operand.hbm [shape: bf16[128,384], index: 3, kind: input, shape index: {}]   ;;  %s2741_s4 = inlined_call_operand.vmem [shape: f32[1,384], index: 4, kind: input, shape index: {}]   ;;  %s2742_s5 = inlined_call_operand.vmem [shape: f32[1,128], index: 5, kind: input, shape index: {}]   ;;  %s2743_s6 = inlined_call_operand.hbm [shape: bf16[128,128], index: 6, kind: input, shape index: {}]   ;;  %s2744_s7 = inlined_call_operand.vmem [shape: f32[1,128], index: 7, kind: input, shape index: {}]   ;;  %s2745_s8 = inlined_call_operand.hbm [shape: f32[8,128], index: 8, kind: output, shape index: {0}]   ;;  %s2746_s9 = inlined_call_operand.hbm [shape: f32[1,128], index: 9, kind: output, shape index: {1}]  }
   0x1   :  { %16 = vsyncpa [#allocation8], 0 }
   0x2   :  { %17 = vsyncpa [#allocation11], 0 }
   0x3   :  { %18 = vsyncpa [#allocation6], 0 }
   0x4   :  { %19 = vsyncpa [#allocation14], 0  ;;  %s2241_s30 = smov [#allocation7]  }
   0x5   :  { %s35_s10 = sshll.u32 %s2241_s30, 4  ;;  %s36_s10 = int_to_ptr.vmem [resolvable:$true] %s35_s10 }
   0x6   :  { %s2119_s11 = scalar_lea.vmem %s36_s10, 3072  ;;  %p2124_p1 = scmp.lt.s32.totalorder %s36_s10, %s36_s10 }
   0x7   :  { %p2120_p0 = scmp.ne.s32.totalorder %s36_s10, %s2119_s11  ;;  %p2125_p2 = scmp.lt.s32.totalorder %s2119_s11, %s2119_s11 }
   0x9   :  { %p2126_p3 = por %p2125_p2, %p2124_p1 }
   0xb   :  { %p2127_p4 = pnand %p2126_p3, %p2120_p0 }
   0xd   :  { %2130 = shalt.err (!%p2127_p4)
}
   0xe   :  { %s2242_s12 = smov 192   ;;  %s2243_s13 = smov 12  }
   0xf   :  { %41 = dma.hbm_to_vmem [thread:$0]  %s2738_s1, 3072, %s36_s10, [#allocation8], %s2242_s12, %s2242_s12, %s2243_s13  }
  0x10   :  { %s2244_s16 = smov [#allocation4]   ;;  %s2245_s18 = smov [#allocation9]  }
  0x11   :  { %s26_s17 = sshll.u32 %s2244_s16, 4  ;;  %s49_s19 = sshll.u32 %s2245_s18, 4  ;;  %s27_s17 = int_to_ptr.vmem [resolvable:$true] %s26_s17  ;;  %s50_s19 = int_to_ptr.vmem [resolvable:$true] %s49_s19 }
  0x12   :  { %s2139_s20 = scalar_lea.vmem %s27_s17, 64  ;;  %p2144_p6 = scmp.lt.s32.totalorder %s27_s17, %s27_s17 }
  0x13   :  { %p2140_p5 = scmp.ne.s32.totalorder %s27_s17, %s2139_s20  ;;  %p2145_p7 = scmp.lt.s32.totalorder %s2139_s20, %s2139_s20 }
  0x15   :  { %p2146_p8 = por %p2145_p7, %p2144_p6 }
  0x17   :  { %p2147_p9 = pnand %p2146_p8, %p2140_p5 }
  0x19   :  { %2150 = shalt.err (!%p2147_p9)
}
  0x1a   :  { %29 = dma.hbm_to_vmem [thread:$0]  %s2737_s0, 64, %s27_s17, [#allocation5]  }
  0x1b   :  { %s2159_s23 = scalar_lea.vmem %s50_s19, 3072  ;;  %p2164_p11 = scmp.lt.s32.totalorder %s50_s19, %s50_s19 }
  0x1c   :  { %p2160_p10 = scmp.ne.s32.totalorder %s50_s19, %s2159_s23  ;;  %p2165_p12 = scmp.lt.s32.totalorder %s2159_s23, %s2159_s23 }
  0x1e   :  { %p2166_p13 = por %p2165_p12, %p2164_p11 }
  0x20   :  { %p2167_p0 = pnand %p2166_p13, %p2160_p10 }
  0x22   :  { %2170 = shalt.err (!%p2167_p0)
}
  0x23   :  { %55 = dma.hbm_to_vmem [thread:$0]  %s2740_s3, 3072, %s50_s19, [#allocation8], %s2242_s12, %s2242_s12, %s2243_s13  }
  0x24   :  { %s2246_s25 = smov [#allocation10]  }
  0x25   :  { %s65_s26 = sshll.u32 %s2246_s25, 4  ;;  %s66_s26 = int_to_ptr.vmem [resolvable:$true] %s65_s26 }
  0x26   :  { %s2179_s27 = scalar_lea.vmem %s66_s26, 1024  ;;  %p2184_p2 = scmp.lt.s32.totalorder %s66_s26, %s66_s26 }
  0x27   :  { %p2180_p1 = scmp.ne.s32.totalorder %s66_s26, %s2179_s27  ;;  %p2185_p3 = scmp.lt.s32.totalorder %s2179_s27, %s2179_s27 }
  0x29   :  { %p2186_p4 = por %p2185_p3, %p2184_p2 }
  0x2b   :  { %p2187_p5 = pnand %p2186_p4, %p2180_p1 }
  0x2d   :  { %2190 = shalt.err (!%p2187_p5)
}
  0x2e   :  { %s2247_s0 = smov 64   ;;  %s2248_s28 = smov 4  }
  0x2f   :  { %71 = dma.hbm_to_vmem [thread:$0]  %s2743_s6, 1024, %s66_s26, [#allocation11], %s2247_s0, %s2247_s0, %s2248_s28  }
  0x30   :  { %2231 = dma.done.wait [#allocation5], 64  }
  0x31   :  { %2232 = vsyncadd [#allocation5], 4294967232 }
  0x32   :  { %2233 = dma.done.wait [#allocation8], 6144  }
  0x33   :  { %2234 = vsyncadd [#allocation8], 4294961152 }
  0x34   :  { %2235 = dma.done.wait [#allocation11], 1024  }
  0x35   :  { %2236 = vsyncadd [#allocation11], 4294966272  ;;  %v2249_v0 = vmov 0.0   ;;  %v2250_v1 = vmov 0   ;;  %vm2251_vm0 = vmmov 0   ;;  %v122_v53 = vlaneseq }
  0x36   :  { %1723 = vmatprep.subr.bf16.mxu1 %v2249_v0  ;;  %297 = vmatprep.mubr.bf16.mxu0 %v2250_v1  ;;  %v1936_v2 = vld [vmem:[#allocation7 + $0xac] ss:$12 sps:$4 sm:$0xff]   ;;  %v1938_v3 = vld [vmem:[#allocation7 + $0xa8] ss:$12 sps:$4 sm:$0xff]   ;;  %v1939_v4 = vld [vmem:[#allocation7 + $0xb0] ss:$12 sps:$4 sm:$0xff]  }
  0x37   :  { %1739 = vmatprep.mubr.msk.bf16.mxu1 %vm2251_vm0, %v2249_v0  ;;  %265 = vmatprep.subr.bf16.mxu0 %v1936_v2  ;;  %v1940_v5 = vld [vmem:[#allocation7 + $0x94] ss:$12 sps:$4 sm:$0xff]   ;;  %v1942_v6 = vld [vmem:[#allocation7 + $0x90] ss:$12 sps:$4 sm:$0xff]   ;;  %v1943_v7 = vld [vmem:[#allocation7 + $0x98] ss:$12 sps:$4 sm:$0xff]  }
  0x38   :  { %266 = vmatpush1.bf16.msra.mxu0 %v1938_v3  ;;  %1724 = vmatpush3.bf16.msra.mxu1 %v1939_v4  ;;  %v1944_v8 = vld [vmem:[#allocation7 + $0x7c] ss:$12 sps:$4 sm:$0xff]   ;;  %v1946_v9 = vld [vmem:[#allocation7 + $0x78] ss:$12 sps:$4 sm:$0xff]   ;;  %v1947_v10 = vld [vmem:[#allocation7 + $0x80] ss:$12 sps:$4 sm:$0xff]  }
  0x39   :  { %267 = vmatprep.subr.bf16.mxu0 %v1940_v5  ;;  %1725 = vmatprep.subr.bf16.mxu1 %v2249_v0  ;;  %v1948_v11 = vld [vmem:[#allocation7 + $0x64] ss:$12 sps:$4 sm:$0xff]   ;;  %v1950_v12 = vld [vmem:[#allocation7 + $0x60] ss:$12 sps:$4 sm:$0xff]   ;;  %v1951_v13 = vld [vmem:[#allocation7 + $0x68] ss:$12 sps:$4 sm:$0xff]  }
  0x3a   :  { %v1952_v14 = vld [vmem:[#allocation7 + $0x4c] ss:$12 sps:$4 sm:$0xff]   ;;  %v1954_v15 = vld [vmem:[#allocation7 + $0x48] ss:$12 sps:$4 sm:$0xff]   ;;  %v1955_v16 = vld [vmem:[#allocation7 + $0x50] ss:$12 sps:$4 sm:$0xff]  }
  0x3b   :  { %v1956_v17 = vld [vmem:[#allocation7 + $0x34] ss:$12 sps:$4 sm:$0xff]   ;;  %v1958_v18 = vld [vmem:[#allocation7 + $0x30] ss:$12 sps:$4 sm:$0xff]   ;;  %v1959_v19 = vld [vmem:[#allocation7 + $0x38] ss:$12 sps:$4 sm:$0xff]  }
  0x3c   :  { %268 = vmatpush1.bf16.msra.mxu0 %v1942_v6  ;;  %1726 = vmatpush3.bf16.msra.mxu1 %v1943_v7  ;;  %v1960_v20 = vld [vmem:[#allocation7 + $0x1c] ss:$12 sps:$4 sm:$0xff]   ;;  %v1962_v21 = vld [vmem:[#allocation7 + $0x18] ss:$12 sps:$4 sm:$0xff]   ;;  %v1963_v22 = vld [vmem:[#allocation7 + $0x20] ss:$12 sps:$4 sm:$0xff]  }
  0x3d   :  { %269 = vmatprep.subr.bf16.mxu0 %v1944_v8  ;;  %1727 = vmatprep.subr.bf16.mxu1 %v2249_v0  ;;  %v1964_v23 = vld [vmem:[#allocation7 + $0x4] ss:$12 sps:$4 sm:$0xff]   ;;  %v1966_v24 = vld [vmem:[#allocation7] ss:$12 sps:$4 sm:$0xff]   ;;  %v1967_v25 = vld [vmem:[#allocation7 + $0x8] ss:$12 sps:$4 sm:$0xff]  }
  0x3e   :  { %v2326_v26 = vld [vmem:[#allocation9 + $0xac] ss:$12 sps:$4 sm:$0xff]   ;;  %v87_v27 = vld [vmem:[#allocation4] sm:$0xf]  ;;  %v2329_v28 = vld [vmem:[#allocation9 + $0xa8] ss:$12 sps:$4 sm:$0xff]  }
  0x3f   :  { %v2331_v29 = vld [vmem:[#allocation9 + $0x94] ss:$12 sps:$4 sm:$0xff]   ;;  %v2334_v30 = vld [vmem:[#allocation9 + $0xb0] ss:$12 sps:$4 sm:$0xff]   ;;  %v2344_v33 = vld [vmem:[#allocation9 + $0x98] ss:$12 sps:$4 sm:$0xff]  }
  0x40   :  { %270 = vmatpush1.bf16.msra.mxu0 %v1946_v9  ;;  %1728 = vmatpush3.bf16.msra.mxu1 %v1947_v10  ;;  %v2337_v31 = vld [vmem:[#allocation9 + $0x90] ss:$12 sps:$4 sm:$0xff]   ;;  %v2346_v34 = vld [vmem:[#allocation9 + $0x78] ss:$12 sps:$4 sm:$0xff]   ;;  %v2352_v36 = vld [vmem:[#allocation9 + $0x80] ss:$12 sps:$4 sm:$0xff]  }
  0x41   :  { %271 = vmatprep.subr.bf16.mxu0 %v1948_v11  ;;  %1729 = vmatprep.subr.bf16.mxu1 %v2249_v0  ;;  %v2340_v32 = vld [vmem:[#allocation9 + $0x7c] ss:$12 sps:$4 sm:$0xff]   ;;  %v2350_v35 = vld [vmem:[#allocation9 + $0x64] ss:$12 sps:$4 sm:$0xff]   ;;  %v2361_v37 = vld [vmem:[#allocation9 + $0x60] ss:$12 sps:$4 sm:$0xff]  }
  0x42   :  { %v2364_v38 = vld [vmem:[#allocation9 + $0x4c] ss:$12 sps:$4 sm:$0xff]   ;;  %v2367_v39 = vld [vmem:[#allocation9 + $0x68] ss:$12 sps:$4 sm:$0xff]   ;;  %v2377_v42 = vld [vmem:[#allocation9 + $0x50] ss:$12 sps:$4 sm:$0xff]  }
  0x43   :  { %v2371_v40 = vld [vmem:[#allocation9 + $0x48] ss:$12 sps:$4 sm:$0xff]   ;;  %v2381_v43 = vld [vmem:[#allocation9 + $0x30] ss:$12 sps:$4 sm:$0xff]   ;;  %v2387_v45 = vld [vmem:[#allocation9 + $0x38] ss:$12 sps:$4 sm:$0xff]  }
  0x44   :  { %272 = vmatpush1.bf16.msra.mxu0 %v1950_v12  ;;  %1730 = vmatpush3.bf16.msra.mxu1 %v1951_v13  ;;  %v2374_v41 = vld [vmem:[#allocation9 + $0x34] ss:$12 sps:$4 sm:$0xff]   ;;  %v2384_v44 = vld [vmem:[#allocation9 + $0x1c] ss:$12 sps:$4 sm:$0xff]   ;;  %v2391_v46 = vld [vmem:[#allocation9 + $0x18] ss:$12 sps:$4 sm:$0xff]  }
  0x45   :  { %273 = vmatprep.subr.bf16.mxu0 %v1952_v14  ;;  %1731 = vmatprep.subr.bf16.mxu1 %v2249_v0  ;;  %v2394_v47 = vld [vmem:[#allocation9 + $0x4] ss:$12 sps:$4 sm:$0xff]   ;;  %v2397_v48 = vld [vmem:[#allocation9 + $0x20] ss:$12 sps:$4 sm:$0xff]   ;;  %v2406_v50 = vld [vmem:[%s2742_s5] sm:$0x1] }
  0x46   :  { %v2401_v49 = vld [vmem:[#allocation9] ss:$12 sps:$4 sm:$0xff]   ;;  %v2410_v51 = vld [vmem:[#allocation9 + $0x8] ss:$12 sps:$4 sm:$0xff]   ;;  %v384_v52 = vpack.c.bf16 %v2406_v50, %v2406_v50  ;;  %v123_v54 = vshrl.u32 %v122_v53, 7 }
  0x47   :  { %v120_v56 = vld [vmem:[%s2739_s2] sm:$0x7] }
  0x48   :  { %274 = vmatpush1.bf16.msra.mxu0 %v1954_v15  ;;  %1732 = vmatpush3.bf16.msra.mxu1 %v1955_v16  ;;  %v124_v55 = vsub.s32 0, %v123_v54  ;;  %v132_v57 = vsub.s32 2, %v123_v54  ;;  %v128_v58 = vsub.s32 1, %v123_v54  ;;  %v381_v11 = vld [vmem:[%s2741_s4] sm:$0x7]  ;;  %s2252_s4 = smov [#allocation13]  }
  0x49   :  { %275 = vmatprep.subr.bf16.mxu0 %v1956_v17  ;;  %1733 = vmatprep.subr.bf16.mxu1 %v2249_v0  ;;  %s1545_s12 = sshll.u32 %s2252_s4, 4  ;;  %s1546_s12 = int_to_ptr.vmem [resolvable:$true] %s1545_s12 }
  0x4a   :  { %v125_v59 = vrot.slane %v120_v56, %v124_v55  ;;  %v133_v60 = vrot.slane %v120_v56, %v132_v57  ;;  %v129_v61 = vrot.slane %v120_v56, %v128_v58  ;;  %v2460_v12 = vrot.slane %v381_v11, %v124_v55  ;;  %s2191_s13 = scalar_lea.vmem %s1546_s12, 16  ;;  %s2195_s14 = scalar_lea.vmem %s1546_s12, 32 }
  0x4b   :  { %v2462_v14 = vrot.slane %v381_v11, %v128_v58  ;;  %v2466_v58 = vrot.slane %v381_v11, %v132_v57  ;;  %p2192_p6 = scmp.ne.s32.totalorder %s1546_s12, %s2191_s13  ;;  %p2196_p7 = scmp.lt.s32.totalorder %s1546_s12, %s1546_s12 }
  0x4c   :  { %276 = vmatpush1.bf16.msra.mxu0 %v1958_v18  ;;  %1734 = vmatpush3.bf16.msra.mxu1 %v1959_v19  ;;  %p2197_p8 = scmp.lt.s32.totalorder %s2195_s14, %s2191_s13 }
  0x4d   :  { %277 = vmatprep.subr.bf16.mxu0 %v1960_v20  ;;  %1735 = vmatprep.subr.bf16.mxu1 %v2249_v0 }
  0x4e   :  { %p2198_p9 = por %p2197_p8, %p2196_p7 }
  0x50   :  { %278 = vmatpush1.bf16.msra.mxu0 %v1962_v21  ;;  %1736 = vmatpush3.bf16.msra.mxu1 %v1963_v22  ;;  %p2199_p10 = pnand %p2198_p9, %p2192_p6 }
  0x51   :  { %279 = vmatprep.subr.bf16.mxu0 %v1964_v23  ;;  %1737 = vmatprep.subr.bf16.mxu1 %v2249_v0 }
  0x54   :  { %280 = vmatpush1.bf16.msra.mxu0 %v1966_v24  ;;  %1738 = vmatpush3.bf16.msra.mxu1 %v1967_v25 }
  0x55   :  { %529 = vmatprep.subr.bf16.mxu0 %v2326_v26  ;;  %1743 = vmatprep.subr.bf16.mxu1 %v2249_v0 }
  0x57   :  { %298 = vmatmul.mubr.bf16.vlgmr.msra.gmra.mxu0 %v87_v27  ;;  %1740 = vmatmul.mubr.bf16.vlgmr.msra.gmra.mxu1 %v87_v27 }
  0x58   :  { %530 = vmatpush1.bf16.msra.mxu0 %v2329_v28  ;;  %1744 = vmatpush3.bf16.msra.mxu1 %v2334_v30 }
  0x59   :  { %531 = vmatprep.subr.bf16.mxu0 %v2331_v29  ;;  %561 = vmatprep.mubr.bf16.mxu0 %v2250_v1 }
  0x5a   :  { %1745 = vmatprep.subr.bf16.mxu1 %v2249_v0  ;;  %1759 = vmatprep.mubr.msk.bf16.mxu1 %vm2251_vm0, %v2249_v0 }
  0x5c   :  { %532 = vmatpush1.bf16.msra.mxu0 %v2337_v31  ;;  %1746 = vmatpush3.bf16.msra.mxu1 %v2344_v33 }
  0x5d   :  { %533 = vmatprep.subr.bf16.mxu0 %v2340_v32  ;;  %1747 = vmatprep.subr.bf16.mxu1 %v2249_v0 }
  0x60   :  { %534 = vmatpush1.bf16.msra.mxu0 %v2346_v34  ;;  %1748 = vmatpush3.bf16.msra.mxu1 %v2352_v36 }
  0x61   :  { %535 = vmatprep.subr.bf16.mxu0 %v2350_v35  ;;  %1749 = vmatprep.subr.bf16.mxu1 %v2249_v0 }
  0x64   :  { %536 = vmatpush1.bf16.msra.mxu0 %v2361_v37  ;;  %1750 = vmatpush3.bf16.msra.mxu1 %v2367_v39 }
  0x65   :  { %537 = vmatprep.subr.bf16.mxu0 %v2364_v38  ;;  %1751 = vmatprep.subr.bf16.mxu1 %v2249_v0 }
  0x68   :  { %538 = vmatpush1.bf16.msra.mxu0 %v2371_v40  ;;  %1752 = vmatpush3.bf16.msra.mxu1 %v2377_v42 }
  0x69   :  { %539 = vmatprep.subr.bf16.mxu0 %v2374_v41  ;;  %1753 = vmatprep.subr.bf16.mxu1 %v2249_v0 }
  0x6c   :  { %540 = vmatpush1.bf16.msra.mxu0 %v2381_v43  ;;  %1754 = vmatpush3.bf16.msra.mxu1 %v2387_v45 }
  0x6d   :  { %541 = vmatprep.subr.bf16.mxu0 %v2384_v44  ;;  %1755 = vmatprep.subr.bf16.mxu1 %v2249_v0 }
  0x70   :  { %542 = vmatpush1.bf16.msra.mxu0 %v2391_v46  ;;  %1756 = vmatpush3.bf16.msra.mxu1 %v2397_v48 }
  0x71   :  { %543 = vmatprep.subr.bf16.mxu0 %v2394_v47  ;;  %1757 = vmatprep.subr.bf16.mxu1 %v2249_v0 }
  0x74   :  { %544 = vmatpush1.bf16.msra.mxu0 %v2401_v49  ;;  %1758 = vmatpush3.bf16.msra.mxu1 %v2410_v51 }
  0x75   :  { %640 = vmatprep.subr.bf16.mxu0 %v2326_v26  ;;  %1763 = vmatprep.subr.bf16.mxu1 %v2249_v0 }
  0x77   :  { %562 = vmatmul.mubr.bf16.vlgmr.msra.gmra.mxu0 %v384_v52  ;;  %1760 = vmatmul.mubr.bf16.vlgmr.msra.gmra.mxu1 %v384_v52 }
  0x78   :  { %641 = vmatpush1.bf16.msra.mxu0 %v2329_v28  ;;  %1764 = vmatpush3.bf16.msra.mxu1 %v2334_v30 }
  0x79   :  { %642 = vmatprep.subr.bf16.mxu0 %v2331_v29  ;;  %1765 = vmatprep.subr.bf16.mxu1 %v2249_v0 }
  0x7a   :  { %672 = vmatprep.mubr.bf16.mxu0 %v2250_v1  ;;  %1779 = vmatprep.mubr.msk.bf16.mxu1 %vm2251_vm0, %v2249_v0 }
  0x7c   :  { %643 = vmatpush1.bf16.msra.mxu0 %v2337_v31  ;;  %1766 = vmatpush3.bf16.msra.mxu1 %v2344_v33 }
  0x7d   :  { %644 = vmatprep.subr.bf16.mxu0 %v2340_v32  ;;  %1767 = vmatprep.subr.bf16.mxu1 %v2249_v0 }
  0x80   :  { %645 = vmatpush1.bf16.msra.mxu0 %v2346_v34  ;;  %1768 = vmatpush3.bf16.msra.mxu1 %v2352_v36 }
  0x81   :  { %646 = vmatprep.subr.bf16.mxu0 %v2350_v35  ;;  %1769 = vmatprep.subr.bf16.mxu1 %v2249_v0 }
  0x84   :  { %647 = vmatpush1.bf16.msra.mxu0 %v2361_v37  ;;  %1770 = vmatpush3.bf16.msra.mxu1 %v2367_v39 }
  0x85   :  { %648 = vmatprep.subr.bf16.mxu0 %v2364_v38  ;;  %1771 = vmatprep.subr.bf16.mxu1 %v2249_v0 }
  0x88   :  { %649 = vmatpush1.bf16.msra.mxu0 %v2371_v40  ;;  %1772 = vmatpush3.bf16.msra.mxu1 %v2377_v42 }
  0x89   :  { %650 = vmatprep.subr.bf16.mxu0 %v2374_v41  ;;  %1773 = vmatprep.subr.bf16.mxu1 %v2249_v0 }
  0x8c   :  { %651 = vmatpush1.bf16.msra.mxu0 %v2381_v43  ;;  %1774 = vmatpush3.bf16.msra.mxu1 %v2387_v45 }
  0x8d   :  { %652 = vmatprep.subr.bf16.mxu0 %v2384_v44  ;;  %1775 = vmatprep.subr.bf16.mxu1 %v2249_v0 }
  0x90   :  { %653 = vmatpush1.bf16.msra.mxu0 %v2391_v46  ;;  %1776 = vmatpush3.bf16.msra.mxu1 %v2397_v48 }
  0x91   :  { %654 = vmatprep.subr.bf16.mxu0 %v2394_v47  ;;  %1777 = vmatprep.subr.bf16.mxu1 %v2249_v0 }
  0x94   :  { %655 = vmatpush1.bf16.msra.mxu0 %v2401_v49  ;;  %1778 = vmatpush3.bf16.msra.mxu1 %v2410_v51 }
  0x95   :  { %751 = vmatprep.subr.bf16.mxu0 %v2326_v26  ;;  %1783 = vmatprep.subr.bf16.mxu1 %v2249_v0 }
 0x117   :  { %v299_v62 = vpop.f32.mrf.mxu0  ;;  %v340_v2 = vpop.f32.mrf.mxu1 }
 0x118   :  { %v300_v63 = vadd.f32 %v299_v62, %v125_v59  ;;  %v341_v4 = vadd.f32 %v340_v2, %v133_v60 }
 0x119   :  { %v301_v3 = vpop.f32.mrf.mxu0  ;;  %v1741_v6 = vpop.f32.mrf.mxu1 }
 0x11a   :  { %346 = vst [vmem:[#allocation2] sm:$0xff] %v300_v63  ;;  %v302_v5 = vadd.f32 %v301_v3, %v129_v61  ;;  %348 = vst [vmem:[#allocation2 + $0x10] sm:$0xff] %v341_v4 }
 0x11b   :  { %v303_v7 = vpop.f32.mrf.mxu0  ;;  %v343_v8 = vpop.f32.mrf.mxu1 }
 0x11c   :  { %347 = vst [vmem:[#allocation2 + $0x8] sm:$0xff] %v302_v5 }
 0x11d   :  { %v304_v9 = vpop.f32.mrf.mxu0  ;;  %v1742_v10 = vpop.f32.mrf.mxu1 }
 0x123   :  { %v383_v17 = vld [vmem:[#allocation2] ss:$8 sm:$0x7] }
 0x124   :  { %v618_v27 = vrot.slane %v383_v17, 1  ;;  %v628_v2 = vrot.slane %v383_v17, 2 }
 0x137   :  { %v563_v13 = vpop.f32.mrf.mxu0  ;;  %v604_v16 = vpop.f32.mrf.mxu1 }
 0x138   :  { %v564_v15 = vadd.f32 %v563_v13, %v2460_v12  ;;  %v605_v61 = vadd.f32 %v604_v16, %v2466_v58  ;;  %v638_v13 = vld [vmem:[#allocation2 + $0x1] ss:$8 sm:$0x7] }
 0x139   :  { %v565_v18 = vpop.f32.mrf.mxu0  ;;  %v1761_v20 = vpop.f32.mrf.mxu1 }
 0x13a   :  { %v610_v19 = vadd.f32 %v564_v15, %v383_v17  ;;  %v566_v23 = vadd.f32 %v565_v18, %v2462_v14 }
 0x13b   :  { %v567_v21 = vpop.f32.mrf.mxu0  ;;  %v607_v24 = vpop.f32.mrf.mxu1 }
 0x13c   :  { %v1608_v22 = vmul.f32 -1.442695, %v610_v19  ;;  %v620_v53 = vadd.f32 %v618_v27, %v566_v23  ;;  %v729_v24 = vrot.slane %v638_v13, 1 }
 0x13d   :  { %v568_v25 = vpop.f32.mrf.mxu0  ;;  %v1762_v52 = vpop.f32.mrf.mxu1 }
 0x13e   :  { %2008 = vpow2.f32 %v1608_v22  ;;  %v1609_v54 = vmul.f32 -1.442695, %v620_v53 }
 0x140   :  { %2010 = vpow2.f32 %v1609_v54 }
 0x14b   :  { %v2009_v55 = vpop.eup %2008 }
 0x14c   :  { %v614_v56 = vadd.f32 1.0, %v2009_v55 }
 0x14d   :  { %v2011_v59 = vpop.eup %2010 }
 0x14e   :  { %2012 = vrcp.f32 %v614_v56  ;;  %v624_v60 = vadd.f32 1.0, %v2011_v59 }
 0x150   :  { %2014 = vrcp.f32 %v624_v60 }
 0x15b   :  { %v2013_v62 = vpop.eup %2012 }
 0x15c   :  { %v627_v63 = vmul.f32 %v2013_v62, %v605_v61  ;;  %v739_v61 = vrot.slane %v638_v13, 2 }
 0x15d   :  { %v2015_v4 = vpop.eup %2014 }
 0x15e   :  { %v630_v3 = vadd.f32 %v628_v2, %v627_v63  ;;  %v632_v5 = vsub.f32 1.0, %v2015_v4  ;;  %v634_v8 = vmul.f32 %v2015_v4, %v2406_v50 }
 0x160   :  { %2016 = vtanh.f32 %v630_v3 }
 0x16d   :  { %v2017_v6 = vpop.eup %2016 }
 0x16e   :  { %v633_v7 = vmul.f32 %v2017_v6, %v632_v5 }
 0x170   :  { %v2470_v9 = vadd.f32 %v634_v8, %v633_v7 }
 0x172   :  { %636 = vst [vmem:[#allocation3] sm:$0x1] %v2470_v9  ;;  %v639_v57 = vpack.c.bf16 %v2470_v9, %v2470_v9 }
 0x174   :  { %673 = vmatmul.mubr.bf16.vlgmr.msra.gmra.mxu0 %v639_v57  ;;  %1780 = vmatmul.mubr.bf16.vlgmr.msra.gmra.mxu1 %v639_v57 }
 0x175   :  { %752 = vmatpush1.bf16.msra.mxu0 %v2329_v28  ;;  %1784 = vmatpush3.bf16.msra.mxu1 %v2334_v30 }
 0x176   :  { %753 = vmatprep.subr.bf16.mxu0 %v2331_v29  ;;  %1785 = vmatprep.subr.bf16.mxu1 %v2249_v0 }
 0x177   :  { %783 = vmatprep.mubr.bf16.mxu0 %v2250_v1  ;;  %1799 = vmatprep.mubr.msk.bf16.mxu1 %vm2251_vm0, %v2249_v0 }
 0x179   :  { %754 = vmatpush1.bf16.msra.mxu0 %v2337_v31  ;;  %1786 = vmatpush3.bf16.msra.mxu1 %v2344_v33 }
 0x17a   :  { %755 = vmatprep.subr.bf16.mxu0 %v2340_v32  ;;  %1787 = vmatprep.subr.bf16.mxu1 %v2249_v0 }
 0x17d   :  { %756 = vmatpush1.bf16.msra.mxu0 %v2346_v34  ;;  %1788 = vmatpush3.bf16.msra.mxu1 %v2352_v36 }
 0x17e   :  { %757 = vmatprep.subr.bf16.mxu0 %v2350_v35  ;;  %1789 = vmatprep.subr.bf16.mxu1 %v2249_v0 }
 0x181   :  { %758 = vmatpush1.bf16.msra.mxu0 %v2361_v37  ;;  %1790 = vmatpush3.bf16.msra.mxu1 %v2367_v39 }
 0x182   :  { %759 = vmatprep.subr.bf16.mxu0 %v2364_v38  ;;  %1791 = vmatprep.subr.bf16.mxu1 %v2249_v0 }
 0x185   :  { %760 = vmatpush1.bf16.msra.mxu0 %v2371_v40  ;;  %1792 = vmatpush3.bf16.msra.mxu1 %v2377_v42 }
 0x186   :  { %761 = vmatprep.subr.bf16.mxu0 %v2374_v41  ;;  %1793 = vmatprep.subr.bf16.mxu1 %v2249_v0 }
 0x189   :  { %762 = vmatpush1.bf16.msra.mxu0 %v2381_v43  ;;  %1794 = vmatpush3.bf16.msra.mxu1 %v2387_v45 }
 0x18a   :  { %763 = vmatprep.subr.bf16.mxu0 %v2384_v44  ;;  %1795 = vmatprep.subr.bf16.mxu1 %v2249_v0 }
 0x18d   :  { %764 = vmatpush1.bf16.msra.mxu0 %v2391_v46  ;;  %1796 = vmatpush3.bf16.msra.mxu1 %v2397_v48 }
 0x18e   :  { %765 = vmatprep.subr.bf16.mxu0 %v2394_v47  ;;  %1797 = vmatprep.subr.bf16.mxu1 %v2249_v0 }
 0x191   :  { %766 = vmatpush1.bf16.msra.mxu0 %v2401_v49  ;;  %1798 = vmatpush3.bf16.msra.mxu1 %v2410_v51 }
 0x192   :  { %862 = vmatprep.subr.bf16.mxu0 %v2326_v26  ;;  %1803 = vmatprep.subr.bf16.mxu1 %v2249_v0 }
 0x234   :  { %v674_v50 = vpop.f32.mrf.mxu0  ;;  %v715_v10 = vpop.f32.mrf.mxu1 }
 0x235   :  { %v675_v11 = vadd.f32 %v674_v50, %v2460_v12  ;;  %v716_v56 = vadd.f32 %v715_v10, %v2466_v58  ;;  %v749_v50 = vld [vmem:[#allocation2 + $0x2] ss:$8 sm:$0x7] }
 0x236   :  { %v676_v15 = vpop.f32.mrf.mxu0  ;;  %v1781_v16 = vpop.f32.mrf.mxu1 }
 0x237   :  { %v721_v17 = vadd.f32 %v675_v11, %v638_v13  ;;  %v677_v21 = vadd.f32 %v676_v15, %v2462_v14 }
 0x238   :  { %v678_v18 = vpop.f32.mrf.mxu0  ;;  %v718_v19 = vpop.f32.mrf.mxu1 }
 0x239   :  { %v1610_v20 = vmul.f32 -1.442695, %v721_v17  ;;  %v731_v25 = vadd.f32 %v729_v24, %v677_v21  ;;  %v840_v21 = vrot.slane %v749_v50, 1 }
 0x23a   :  { %v679_v22 = vpop.f32.mrf.mxu0  ;;  %v1782_v23 = vpop.f32.mrf.mxu1 }
 0x23b   :  { %2018 = vpow2.f32 %v1610_v20  ;;  %v1611_v27 = vmul.f32 -1.442695, %v731_v25 }
 0x23d   :  { %2020 = vpow2.f32 %v1611_v27 }
 0x248   :  { %v2019_v52 = vpop.eup %2018 }
 0x249   :  { %v725_v53 = vadd.f32 1.0, %v2019_v52 }
 0x24a   :  { %v2021_v54 = vpop.eup %2020 }
 0x24b   :  { %2022 = vrcp.f32 %v725_v53  ;;  %v735_v55 = vadd.f32 1.0, %v2021_v54 }
 0x24d   :  { %2024 = vrcp.f32 %v735_v55 }
 0x258   :  { %v2023_v59 = vpop.eup %2022 }
 0x259   :  { %v738_v60 = vmul.f32 %v2023_v59, %v716_v56  ;;  %v850_v56 = vrot.slane %v749_v50, 2 }
 0x25a   :  { %v2025_v63 = vpop.eup %2024 }
 0x25b   :  { %v741_v62 = vadd.f32 %v739_v61, %v738_v60  ;;  %v743_v2 = vsub.f32 1.0, %v2025_v63  ;;  %v745_v5 = vmul.f32 %v2025_v63, %v2470_v9 }
 0x25d   :  { %2026 = vtanh.f32 %v741_v62 }
 0x26a   :  { %v2027_v3 = vpop.eup %2026 }
 0x26b   :  { %v744_v4 = vmul.f32 %v2027_v3, %v743_v2 }
 0x26d   :  { %v2514_v6 = vadd.f32 %v745_v5, %v744_v4 }
 0x26f   :  { %747 = vst [vmem:[#allocation3 + $0x1] sm:$0x1] %v2514_v6  ;;  %v750_v7 = vpack.c.bf16 %v2514_v6, %v2514_v6 }
 0x271   :  { %784 = vmatmul.mubr.bf16.vlgmr.msra.gmra.mxu0 %v750_v7  ;;  %1800 = vmatmul.mubr.bf16.vlgmr.msra.gmra.mxu1 %v750_v7 }
 0x272   :  { %863 = vmatpush1.bf16.msra.mxu0 %v2329_v28  ;;  %1804 = vmatpush3.bf16.msra.mxu1 %v2334_v30 }
 0x273   :  { %864 = vmatprep.subr.bf16.mxu0 %v2331_v29  ;;  %1805 = vmatprep.subr.bf16.mxu1 %v2249_v0 }
 0x274   :  { %894 = vmatprep.mubr.bf16.mxu0 %v2250_v1  ;;  %1819 = vmatprep.mubr.msk.bf16.mxu1 %vm2251_vm0, %v2249_v0 }
 0x276   :  { %865 = vmatpush1.bf16.msra.mxu0 %v2337_v31  ;;  %1806 = vmatpush3.bf16.msra.mxu1 %v2344_v33 }
 0x277   :  { %866 = vmatprep.subr.bf16.mxu0 %v2340_v32  ;;  %1807 = vmatprep.subr.bf16.mxu1 %v2249_v0 }
 0x27a   :  { %867 = vmatpush1.bf16.msra.mxu0 %v2346_v34  ;;  %1808 = vmatpush3.bf16.msra.mxu1 %v2352_v36 }
 0x27b   :  { %868 = vmatprep.subr.bf16.mxu0 %v2350_v35  ;;  %1809 = vmatprep.subr.bf16.mxu1 %v2249_v0 }
 0x27e   :  { %869 = vmatpush1.bf16.msra.mxu0 %v2361_v37  ;;  %1810 = vmatpush3.bf16.msra.mxu1 %v2367_v39 }
 0x27f   :  { %870 = vmatprep.subr.bf16.mxu0 %v2364_v38  ;;  %1811 = vmatprep.subr.bf16.mxu1 %v2249_v0 }
 0x282   :  { %871 = vmatpush1.bf16.msra.mxu0 %v2371_v40  ;;  %1812 = vmatpush3.bf16.msra.mxu1 %v2377_v42 }
 0x283   :  { %872 = vmatprep.subr.bf16.mxu0 %v2374_v41  ;;  %1813 = vmatprep.subr.bf16.mxu1 %v2249_v0 }
 0x286   :  { %873 = vmatpush1.bf16.msra.mxu0 %v2381_v43  ;;  %1814 = vmatpush3.bf16.msra.mxu1 %v2387_v45 }
 0x287   :  { %874 = vmatprep.subr.bf16.mxu0 %v2384_v44  ;;  %1815 = vmatprep.subr.bf16.mxu1 %v2249_v0 }
 0x28a   :  { %875 = vmatpush1.bf16.msra.mxu0 %v2391_v46  ;;  %1816 = vmatpush3.bf16.msra.mxu1 %v2397_v48 }
 0x28b   :  { %876 = vmatprep.subr.bf16.mxu0 %v2394_v47  ;;  %1817 = vmatprep.subr.bf16.mxu1 %v2249_v0 }
 0x28e   :  { %877 = vmatpush1.bf16.msra.mxu0 %v2401_v49  ;;  %1818 = vmatpush3.bf16.msra.mxu1 %v2410_v51 }
 0x28f   :  { %973 = vmatprep.subr.bf16.mxu0 %v2326_v26  ;;  %1823 = vmatprep.subr.bf16.mxu1 %v2249_v0 }
 0x331   :  { %v785_v8 = vpop.f32.mrf.mxu0  ;;  %v826_v9 = vpop.f32.mrf.mxu1 }
 0x332   :  { %v786_v57 = vadd.f32 %v785_v8, %v2460_v12  ;;  %v827_v53 = vadd.f32 %v826_v9, %v2466_v58  ;;  %v860_v8 = vld [vmem:[#allocation2 + $0x3] ss:$8 sm:$0x7] }
 0x333   :  { %v787_v10 = vpop.f32.mrf.mxu0  ;;  %v1801_v11 = vpop.f32.mrf.mxu1 }
 0x334   :  { %v832_v13 = vadd.f32 %v786_v57, %v749_v50  ;;  %v788_v18 = vadd.f32 %v787_v10, %v2462_v14 }
 0x335   :  { %v789_v15 = vpop.f32.mrf.mxu0  ;;  %v829_v16 = vpop.f32.mrf.mxu1 }
 0x336   :  { %v1612_v17 = vmul.f32 -1.442695, %v832_v13  ;;  %v842_v22 = vadd.f32 %v840_v21, %v788_v18  ;;  %v951_v18 = vrot.slane %v860_v8, 1 }
 0x337   :  { %v790_v19 = vpop.f32.mrf.mxu0  ;;  %v1802_v20 = vpop.f32.mrf.mxu1 }
 0x338   :  { %2028 = vpow2.f32 %v1612_v17  ;;  %v1613_v23 = vmul.f32 -1.442695, %v842_v22 }
 0x33a   :  { %2030 = vpow2.f32 %v1613_v23 }
 0x345   :  { %v2029_v24 = vpop.eup %2028 }
 0x346   :  { %v836_v25 = vadd.f32 1.0, %v2029_v24 }
 0x347   :  { %v2031_v27 = vpop.eup %2030 }
 0x348   :  { %2032 = vrcp.f32 %v836_v25  ;;  %v846_v52 = vadd.f32 1.0, %v2031_v27 }
 0x34a   :  { %2034 = vrcp.f32 %v846_v52 }
 0x355   :  { %v2033_v54 = vpop.eup %2032 }
 0x356   :  { %v849_v55 = vmul.f32 %v2033_v54, %v827_v53  ;;  %v961_v53 = vrot.slane %v860_v8, 2 }
 0x357   :  { %v2035_v60 = vpop.eup %2034 }
 0x358   :  { %v852_v59 = vadd.f32 %v850_v56, %v849_v55  ;;  %v854_v61 = vsub.f32 1.0, %v2035_v60  ;;  %v856_v2 = vmul.f32 %v2035_v60, %v2514_v6 }
 0x35a   :  { %2036 = vtanh.f32 %v852_v59 }
 0x367   :  { %v2037_v62 = vpop.eup %2036 }
 0x368   :  { %v855_v63 = vmul.f32 %v2037_v62, %v854_v61 }
 0x36a   :  { %v2558_v3 = vadd.f32 %v856_v2, %v855_v63 }
 0x36c   :  { %858 = vst [vmem:[#allocation3 + $0x2] sm:$0x1] %v2558_v3  ;;  %v861_v4 = vpack.c.bf16 %v2558_v3, %v2558_v3 }
 0x36e   :  { %895 = vmatmul.mubr.bf16.vlgmr.msra.gmra.mxu0 %v861_v4  ;;  %1820 = vmatmul.mubr.bf16.vlgmr.msra.gmra.mxu1 %v861_v4 }
 0x36f   :  { %974 = vmatpush1.bf16.msra.mxu0 %v2329_v28  ;;  %1824 = vmatpush3.bf16.msra.mxu1 %v2334_v30 }
 0x370   :  { %975 = vmatprep.subr.bf16.mxu0 %v2331_v29  ;;  %1825 = vmatprep.subr.bf16.mxu1 %v2249_v0 }
 0x371   :  { %1005 = vmatprep.mubr.bf16.mxu0 %v2250_v1  ;;  %1839 = vmatprep.mubr.msk.bf16.mxu1 %vm2251_vm0, %v2249_v0 }
 0x373   :  { %976 = vmatpush1.bf16.msra.mxu0 %v2337_v31  ;;  %1826 = vmatpush3.bf16.msra.mxu1 %v2344_v33 }
 0x374   :  { %977 = vmatprep.subr.bf16.mxu0 %v2340_v32  ;;  %1827 = vmatprep.subr.bf16.mxu1 %v2249_v0 }
 0x377   :  { %978 = vmatpush1.bf16.msra.mxu0 %v2346_v34  ;;  %1828 = vmatpush3.bf16.msra.mxu1 %v2352_v36 }
 0x378   :  { %979 = vmatprep.subr.bf16.mxu0 %v2350_v35  ;;  %1829 = vmatprep.subr.bf16.mxu1 %v2249_v0 }
 0x37b   :  { %980 = vmatpush1.bf16.msra.mxu0 %v2361_v37  ;;  %1830 = vmatpush3.bf16.msra.mxu1 %v2367_v39 }
 0x37c   :  { %981 = vmatprep.subr.bf16.mxu0 %v2364_v38  ;;  %1831 = vmatprep.subr.bf16.mxu1 %v2249_v0 }
 0x37f   :  { %982 = vmatpush1.bf16.msra.mxu0 %v2371_v40  ;;  %1832 = vmatpush3.bf16.msra.mxu1 %v2377_v42 }
 0x380   :  { %983 = vmatprep.subr.bf16.mxu0 %v2374_v41  ;;  %1833 = vmatprep.subr.bf16.mxu1 %v2249_v0 }
 0x383   :  { %984 = vmatpush1.bf16.msra.mxu0 %v2381_v43  ;;  %1834 = vmatpush3.bf16.msra.mxu1 %v2387_v45 }
 0x384   :  { %985 = vmatprep.subr.bf16.mxu0 %v2384_v44  ;;  %1835 = vmatprep.subr.bf16.mxu1 %v2249_v0 }
 0x387   :  { %986 = vmatpush1.bf16.msra.mxu0 %v2391_v46  ;;  %1836 = vmatpush3.bf16.msra.mxu1 %v2397_v48 }
 0x388   :  { %987 = vmatprep.subr.bf16.mxu0 %v2394_v47  ;;  %1837 = vmatprep.subr.bf16.mxu1 %v2249_v0 }
 0x38b   :  { %988 = vmatpush1.bf16.msra.mxu0 %v2401_v49  ;;  %1838 = vmatpush3.bf16.msra.mxu1 %v2410_v51 }
 0x38c   :  { %1084 = vmatprep.subr.bf16.mxu0 %v2326_v26  ;;  %1843 = vmatprep.subr.bf16.mxu1 %v2249_v0 }
 0x42e   :  { %v896_v5 = vpop.f32.mrf.mxu0  ;;  %v937_v6 = vpop.f32.mrf.mxu1 }
 0x42f   :  { %v897_v7 = vadd.f32 %v896_v5, %v2460_v12  ;;  %v938_v25 = vadd.f32 %v937_v6, %v2466_v58  ;;  %v971_v5 = vld [vmem:[#allocation2 + $0x4] ss:$8 sm:$0x7] }
 0x430   :  { %v898_v9 = vpop.f32.mrf.mxu0  ;;  %v1821_v57 = vpop.f32.mrf.mxu1 }
 0x431   :  { %v943_v50 = vadd.f32 %v897_v7, %v860_v8  ;;  %v899_v15 = vadd.f32 %v898_v9, %v2462_v14 }
 0x432   :  { %v900_v10 = vpop.f32.mrf.mxu0  ;;  %v940_v11 = vpop.f32.mrf.mxu1 }
 0x433   :  { %v1614_v13 = vmul.f32 -1.442695, %v943_v50  ;;  %v953_v19 = vadd.f32 %v951_v18, %v899_v15  ;;  %v1062_v15 = vrot.slane %v971_v5, 1 }
 0x434   :  { %v901_v16 = vpop.f32.mrf.mxu0  ;;  %v1822_v17 = vpop.f32.mrf.mxu1 }
 0x435   :  { %2038 = vpow2.f32 %v1614_v13  ;;  %v1615_v20 = vmul.f32 -1.442695, %v953_v19 }
 0x437   :  { %2040 = vpow2.f32 %v1615_v20 }
 0x442   :  { %v2039_v21 = vpop.eup %2038 }
 0x443   :  { %v947_v22 = vadd.f32 1.0, %v2039_v21 }
 0x444   :  { %v2041_v23 = vpop.eup %2040 }
 0x445   :  { %2042 = vrcp.f32 %v947_v22  ;;  %v957_v24 = vadd.f32 1.0, %v2041_v23 }
 0x447   :  { %2044 = vrcp.f32 %v957_v24  ;;  %v1072_v24 = vrot.slane %v971_v5, 2 }
 0x452   :  { %v2043_v27 = vpop.eup %2042 }
 0x453   :  { %v960_v52 = vmul.f32 %v2043_v27, %v938_v25 }
 0x454   :  { %v2045_v55 = vpop.eup %2044 }
 0x455   :  { %v963_v54 = vadd.f32 %v961_v53, %v960_v52  ;;  %v965_v56 = vsub.f32 1.0, %v2045_v55  ;;  %v967_v61 = vmul.f32 %v2045_v55, %v2558_v3 }
 0x457   :  { %2046 = vtanh.f32 %v963_v54 }
 0x464   :  { %v2047_v59 = vpop.eup %2046 }
 0x465   :  { %v966_v60 = vmul.f32 %v2047_v59, %v965_v56 }
 0x467   :  { %v2602_v62 = vadd.f32 %v967_v61, %v966_v60 }
 0x469   :  { %969 = vst [vmem:[#allocation3 + $0x3] sm:$0x1] %v2602_v62  ;;  %v972_v63 = vpack.c.bf16 %v2602_v62, %v2602_v62 }
 0x46b   :  { %1006 = vmatmul.mubr.bf16.vlgmr.msra.gmra.mxu0 %v972_v63  ;;  %1840 = vmatmul.mubr.bf16.vlgmr.msra.gmra.mxu1 %v972_v63 }
 0x46c   :  { %1085 = vmatpush1.bf16.msra.mxu0 %v2329_v28  ;;  %1844 = vmatpush3.bf16.msra.mxu1 %v2334_v30 }
 0x46d   :  { %1086 = vmatprep.subr.bf16.mxu0 %v2331_v29  ;;  %1845 = vmatprep.subr.bf16.mxu1 %v2249_v0 }
 0x46e   :  { %1116 = vmatprep.mubr.bf16.mxu0 %v2250_v1  ;;  %1859 = vmatprep.mubr.msk.bf16.mxu1 %vm2251_vm0, %v2249_v0 }
 0x470   :  { %1087 = vmatpush1.bf16.msra.mxu0 %v2337_v31  ;;  %1846 = vmatpush3.bf16.msra.mxu1 %v2344_v33 }
 0x471   :  { %1088 = vmatprep.subr.bf16.mxu0 %v2340_v32  ;;  %1847 = vmatprep.subr.bf16.mxu1 %v2249_v0 }
 0x474   :  { %1089 = vmatpush1.bf16.msra.mxu0 %v2346_v34  ;;  %1848 = vmatpush3.bf16.msra.mxu1 %v2352_v36 }
 0x475   :  { %1090 = vmatprep.subr.bf16.mxu0 %v2350_v35  ;;  %1849 = vmatprep.subr.bf16.mxu1 %v2249_v0 }
 0x478   :  { %1091 = vmatpush1.bf16.msra.mxu0 %v2361_v37  ;;  %1850 = vmatpush3.bf16.msra.mxu1 %v2367_v39 }
 0x479   :  { %1092 = vmatprep.subr.bf16.mxu0 %v2364_v38  ;;  %1851 = vmatprep.subr.bf16.mxu1 %v2249_v0 }
 0x47c   :  { %1093 = vmatpush1.bf16.msra.mxu0 %v2371_v40  ;;  %1852 = vmatpush3.bf16.msra.mxu1 %v2377_v42 }
 0x47d   :  { %1094 = vmatprep.subr.bf16.mxu0 %v2374_v41  ;;  %1853 = vmatprep.subr.bf16.mxu1 %v2249_v0 }
 0x480   :  { %1095 = vmatpush1.bf16.msra.mxu0 %v2381_v43  ;;  %1854 = vmatpush3.bf16.msra.mxu1 %v2387_v45 }
 0x481   :  { %1096 = vmatprep.subr.bf16.mxu0 %v2384_v44  ;;  %1855 = vmatprep.subr.bf16.mxu1 %v2249_v0 }
 0x484   :  { %1097 = vmatpush1.bf16.msra.mxu0 %v2391_v46  ;;  %1856 = vmatpush3.bf16.msra.mxu1 %v2397_v48 }
 0x485   :  { %1098 = vmatprep.subr.bf16.mxu0 %v2394_v47  ;;  %1857 = vmatprep.subr.bf16.mxu1 %v2249_v0 }
 0x488   :  { %1099 = vmatpush1.bf16.msra.mxu0 %v2401_v49  ;;  %1858 = vmatpush3.bf16.msra.mxu1 %v2410_v51 }
 0x489   :  { %1195 = vmatprep.subr.bf16.mxu0 %v2326_v26  ;;  %1863 = vmatprep.subr.bf16.mxu1 %v2249_v0 }
 0x52b   :  { %v1007_v2 = vpop.f32.mrf.mxu0  ;;  %v1048_v3 = vpop.f32.mrf.mxu1 }
 0x52c   :  { %v1008_v4 = vadd.f32 %v1007_v2, %v2460_v12  ;;  %v1049_v21 = vadd.f32 %v1048_v3, %v2466_v58 }
 0x52d   :  { %v1009_v6 = vpop.f32.mrf.mxu0  ;;  %v1841_v7 = vpop.f32.mrf.mxu1 }
 0x52e   :  { %v1054_v8 = vadd.f32 %v1008_v4, %v971_v5  ;;  %v1010_v10 = vadd.f32 %v1009_v6, %v2462_v14 }
 0x52f   :  { %v1011_v9 = vpop.f32.mrf.mxu0  ;;  %v1051_v57 = vpop.f32.mrf.mxu1 }
 0x530   :  { %v1616_v50 = vmul.f32 -1.442695, %v1054_v8  ;;  %v1064_v26 = vadd.f32 %v1062_v15, %v1010_v10  ;;  %v2089_v9 = vld [vmem:[#allocation9 + $0xa8] ss:$12 sps:$4 sm:$0xff]   ;;  %v2090_v57 = vld [vmem:[#allocation9 + $0xb0] ss:$12 sps:$4 sm:$0xff]  }
 0x531   :  { %v1012_v11 = vpop.f32.mrf.mxu0  ;;  %v1842_v13 = vpop.f32.mrf.mxu1  ;;  %v2092_v10 = vld [vmem:[#allocation9 + $0x90] ss:$12 sps:$4 sm:$0xff]   ;;  %v2095_v15 = vld [vmem:[#allocation9 + $0x78] ss:$12 sps:$4 sm:$0xff]  }
 0x532   :  { %2048 = vpow2.f32 %v1616_v50  ;;  %v1617_v16 = vmul.f32 -1.442695, %v1064_v26  ;;  %v2091_v50 = vld [vmem:[#allocation9 + $0x94] ss:$12 sps:$4 sm:$0xff]   ;;  %v2093_v11 = vld [vmem:[#allocation9 + $0x98] ss:$12 sps:$4 sm:$0xff]  }
 0x533   :  { %v2094_v13 = vld [vmem:[#allocation9 + $0x7c] ss:$12 sps:$4 sm:$0xff]   ;;  %v2096_v26 = vld [vmem:[#allocation9 + $0x80] ss:$12 sps:$4 sm:$0xff]  }
 0x534   :  { %2050 = vpow2.f32 %v1617_v16  ;;  %v2097_v16 = vld [vmem:[#allocation9 + $0x64] ss:$12 sps:$4 sm:$0xff]  }
 0x53f   :  { %v2049_v17 = vpop.eup %2048 }
 0x540   :  { %v1058_v18 = vadd.f32 1.0, %v2049_v17  ;;  %v2099_v17 = vld [vmem:[#allocation9 + $0x68] ss:$12 sps:$4 sm:$0xff]  }
 0x541   :  { %v2051_v19 = vpop.eup %2050 }
 0x542   :  { %2052 = vrcp.f32 %v1058_v18  ;;  %v1068_v20 = vadd.f32 1.0, %v2051_v19  ;;  %v2100_v18 = vld [vmem:[#allocation9 + $0x4c] ss:$12 sps:$4 sm:$0xff]   ;;  %v2101_v19 = vld [vmem:[#allocation9 + $0x48] ss:$12 sps:$4 sm:$0xff]  }
 0x544   :  { %2054 = vrcp.f32 %v1068_v20  ;;  %v2102_v20 = vld [vmem:[#allocation9 + $0x50] ss:$12 sps:$4 sm:$0xff]  }
 0x54f   :  { %v2053_v22 = vpop.eup %2052 }
 0x550   :  { %v1071_v23 = vmul.f32 %v2053_v22, %v1049_v21  ;;  %v2103_v21 = vld [vmem:[#allocation9 + $0x34] ss:$12 sps:$4 sm:$0xff]   ;;  %v2104_v22 = vld [vmem:[#allocation9 + $0x30] ss:$12 sps:$4 sm:$0xff]  }
 0x551   :  { %v2055_v27 = vpop.eup %2054 }
 0x552   :  { %v1074_v25 = vadd.f32 %v1072_v24, %v1071_v23  ;;  %v1076_v52 = vsub.f32 1.0, %v2055_v27  ;;  %v1078_v55 = vmul.f32 %v2055_v27, %v2602_v62  ;;  %v2105_v23 = vld [vmem:[#allocation9 + $0x38] ss:$12 sps:$4 sm:$0xff]   ;;  %v2106_v24 = vld [vmem:[#allocation9 + $0x1c] ss:$12 sps:$4 sm:$0xff]  }
 0x553   :  { %v2108_v27 = vld [vmem:[#allocation9 + $0x20] ss:$12 sps:$4 sm:$0xff]  }
 0x554   :  { %2056 = vtanh.f32 %v1074_v25  ;;  %v2107_v25 = vld [vmem:[#allocation9 + $0x18] ss:$12 sps:$4 sm:$0xff]  }
 0x561   :  { %v2057_v53 = vpop.eup %2056 }
 0x562   :  { %v1077_v54 = vmul.f32 %v2057_v53, %v1076_v52  ;;  %v2109_v52 = vld [vmem:[#allocation9 + $0x4] ss:$12 sps:$4 sm:$0xff]   ;;  %v2110_v53 = vld [vmem:[#allocation9] ss:$12 sps:$4 sm:$0xff]  }
 0x564   :  { %v2646_v56 = vadd.f32 %v1078_v55, %v1077_v54 }
 0x566   :  { %1080 = vst [vmem:[#allocation3 + $0x4] sm:$0x1] %v2646_v56  ;;  %v1083_v59 = vpack.c.bf16 %v2646_v56, %v2646_v56 }
 0x568   :  { %1117 = vmatmul.mubr.bf16.vlgmr.msra.gmra.mxu0 %v1083_v59  ;;  %1860 = vmatmul.mubr.bf16.vlgmr.msra.gmra.mxu1 %v1083_v59  ;;  %v1193_v59 = vld [vmem:[#allocation2 + $0x6] ss:$8 sm:$0x7] }
 0x569   :  { %1196 = vmatpush1.bf16.msra.mxu0 %v2329_v28  ;;  %1864 = vmatpush3.bf16.msra.mxu1 %v2334_v30  ;;  %v2088_v28 = vld [vmem:[#allocation9 + $0xac] ss:$12 sps:$4 sm:$0xff]  }
 0x56a   :  { %1197 = vmatprep.subr.bf16.mxu0 %v2331_v29  ;;  %1865 = vmatprep.subr.bf16.mxu1 %v2249_v0 }
 0x56b   :  { %1227 = vmatprep.mubr.bf16.mxu0 %v2250_v1  ;;  %1879 = vmatprep.mubr.msk.bf16.mxu1 %vm2251_vm0, %v2249_v0 }
 0x56d   :  { %1198 = vmatpush1.bf16.msra.mxu0 %v2337_v31  ;;  %1866 = vmatpush3.bf16.msra.mxu1 %v2344_v33 }
 0x56e   :  { %1199 = vmatprep.subr.bf16.mxu0 %v2340_v32  ;;  %1867 = vmatprep.subr.bf16.mxu1 %v2249_v0  ;;  %v1082_v32 = vld [vmem:[#allocation2 + $0x5] ss:$8 sm:$0x7] }
 0x56f   :  { %v1183_v62 = vrot.slane %v1082_v32, 2 }
 0x571   :  { %1200 = vmatpush1.bf16.msra.mxu0 %v2346_v34  ;;  %1868 = vmatpush3.bf16.msra.mxu1 %v2352_v36 }
 0x572   :  { %1201 = vmatprep.subr.bf16.mxu0 %v2350_v35  ;;  %1869 = vmatprep.subr.bf16.mxu1 %v2249_v0 }
 0x575   :  { %1202 = vmatpush1.bf16.msra.mxu0 %v2361_v37  ;;  %1870 = vmatpush3.bf16.msra.mxu1 %v2367_v39 }
 0x576   :  { %1203 = vmatprep.subr.bf16.mxu0 %v2364_v38  ;;  %1871 = vmatprep.subr.bf16.mxu1 %v2249_v0 }
 0x579   :  { %1204 = vmatpush1.bf16.msra.mxu0 %v2371_v40  ;;  %1872 = vmatpush3.bf16.msra.mxu1 %v2377_v42  ;;  %v1173_v42 = vrot.slane %v1082_v32, 1 }
 0x57a   :  { %1205 = vmatprep.subr.bf16.mxu0 %v2374_v41  ;;  %1873 = vmatprep.subr.bf16.mxu1 %v2249_v0 }
 0x57d   :  { %1206 = vmatpush1.bf16.msra.mxu0 %v2381_v43  ;;  %1874 = vmatpush3.bf16.msra.mxu1 %v2387_v45 }
 0x57e   :  { %1207 = vmatprep.subr.bf16.mxu0 %v2384_v44  ;;  %1875 = vmatprep.subr.bf16.mxu1 %v2249_v0 }
 0x581   :  { %1208 = vmatpush1.bf16.msra.mxu0 %v2391_v46  ;;  %1876 = vmatpush3.bf16.msra.mxu1 %v2397_v48 }
 0x582   :  { %1209 = vmatprep.subr.bf16.mxu0 %v2394_v47  ;;  %1877 = vmatprep.subr.bf16.mxu1 %v2249_v0 }
 0x585   :  { %1210 = vmatpush1.bf16.msra.mxu0 %v2401_v49  ;;  %1878 = vmatpush3.bf16.msra.mxu1 %v2410_v51 }
 0x586   :  { %1306 = vmatprep.subr.bf16.mxu0 %v2088_v28  ;;  %1883 = vmatprep.subr.bf16.mxu1 %v2249_v0 }
 0x628   :  { %v1118_v29 = vpop.f32.mrf.mxu0  ;;  %v1159_v30 = vpop.f32.mrf.mxu1 }
 0x629   :  { %v1119_v31 = vadd.f32 %v1118_v29, %v2460_v12  ;;  %v1160_v49 = vadd.f32 %v1159_v30, %v2466_v58 }
 0x62a   :  { %v1120_v33 = vpop.f32.mrf.mxu0  ;;  %v1861_v34 = vpop.f32.mrf.mxu1 }
 0x62b   :  { %v1165_v35 = vadd.f32 %v1119_v31, %v1082_v32  ;;  %v1121_v39 = vadd.f32 %v1120_v33, %v2462_v14 }
 0x62c   :  { %v1122_v36 = vpop.f32.mrf.mxu0  ;;  %v1162_v37 = vpop.f32.mrf.mxu1 }
 0x62d   :  { %v1618_v38 = vmul.f32 -1.442695, %v1165_v35  ;;  %v1175_v43 = vadd.f32 %v1173_v42, %v1121_v39  ;;  %v1284_v37 = vrot.slane %v1193_v59, 1 }
 0x62e   :  { %v1123_v40 = vpop.f32.mrf.mxu0  ;;  %v1862_v41 = vpop.f32.mrf.mxu1 }
 0x62f   :  { %2058 = vpow2.f32 %v1618_v38  ;;  %v1619_v44 = vmul.f32 -1.442695, %v1175_v43 }
 0x631   :  { %2060 = vpow2.f32 %v1619_v44 }
 0x63c   :  { %v2059_v45 = vpop.eup %2058 }
 0x63d   :  { %v1169_v46 = vadd.f32 1.0, %v2059_v45 }
 0x63e   :  { %v2061_v47 = vpop.eup %2060 }
 0x63f   :  { %2062 = vrcp.f32 %v1169_v46  ;;  %v1179_v48 = vadd.f32 1.0, %v2061_v47  ;;  %v1294_v46 = vrot.slane %v1193_v59, 2 }
 0x641   :  { %2064 = vrcp.f32 %v1179_v48 }
 0x64c   :  { %v2063_v60 = vpop.eup %2062 }
 0x64d   :  { %v1182_v61 = vmul.f32 %v2063_v60, %v1160_v49 }
 0x64e   :  { %v2065_v2 = vpop.eup %2064 }
 0x64f   :  { %v1185_v63 = vadd.f32 %v1183_v62, %v1182_v61  ;;  %v1187_v3 = vsub.f32 1.0, %v2065_v2  ;;  %v1189_v6 = vmul.f32 %v2065_v2, %v2646_v56 }
 0x651   :  { %2066 = vtanh.f32 %v1185_v63 }
 0x65e   :  { %v2067_v4 = vpop.eup %2066 }
 0x65f   :  { %v1188_v5 = vmul.f32 %v2067_v4, %v1187_v3  ;;  %v2000_v3 = vld [vmem:[#allocation10 + $0x38] sm:$0xff]   ;;  %v2001_v4 = vld [vmem:[#allocation10 + $0x30] sm:$0xff]  }
 0x661   :  { %v2689_v7 = vadd.f32 %v1189_v6, %v1188_v5  ;;  %v2002_v5 = vld [vmem:[#allocation10 + $0x28] sm:$0xff]   ;;  %v2003_v6 = vld [vmem:[#allocation10 + $0x20] sm:$0xff]  }
 0x663   :  { %1191 = vst [vmem:[#allocation3 + $0x5] sm:$0x1] %v2689_v7  ;;  %v1194_v8 = vpack.c.bf16 %v2689_v7, %v2689_v7 }
 0x665   :  { %1228 = vmatmul.mubr.bf16.vlgmr.msra.gmra.mxu0 %v1194_v8  ;;  %1880 = vmatmul.mubr.bf16.vlgmr.msra.gmra.mxu1 %v1194_v8  ;;  %v2005_v8 = vld [vmem:[#allocation10 + $0x10] sm:$0xff]  }
 0x666   :  { %1307 = vmatpush1.bf16.msra.mxu0 %v2089_v9  ;;  %1884 = vmatpush3.bf16.msra.mxu1 %v2090_v57  ;;  %v2006_v9 = vld [vmem:[#allocation10 + $0x8] sm:$0xff]   ;;  %v2007_v57 = vld [vmem:[#allocation10] sm:$0xff]  }
 0x667   :  { %1308 = vmatprep.subr.bf16.mxu0 %v2091_v50  ;;  %1885 = vmatprep.subr.bf16.mxu1 %v2249_v0 }
 0x668   :  { %1338 = vmatprep.mubr.bf16.mxu0 %v2250_v1  ;;  %1899 = vmatprep.mubr.msk.bf16.mxu1 %vm2251_vm0, %v2249_v0  ;;  %v2098_v1 = vld [vmem:[#allocation9 + $0x60] ss:$12 sps:$4 sm:$0xff]  }
 0x66a   :  { %1309 = vmatpush1.bf16.msra.mxu0 %v2092_v10  ;;  %1886 = vmatpush3.bf16.msra.mxu1 %v2093_v11 }
 0x66b   :  { %1310 = vmatprep.subr.bf16.mxu0 %v2094_v13  ;;  %1887 = vmatprep.subr.bf16.mxu1 %v2249_v0  ;;  %v1304_v13 = vld [vmem:[#allocation2 + $0x7] ss:$8 sm:$0x7] }
 0x66e   :  { %1311 = vmatpush1.bf16.msra.mxu0 %v2095_v15  ;;  %1888 = vmatpush3.bf16.msra.mxu1 %v2096_v26 }
 0x66f   :  { %1312 = vmatprep.subr.bf16.mxu0 %v2097_v16  ;;  %1889 = vmatprep.subr.bf16.mxu1 %v2249_v0 }
 0x672   :  { %1313 = vmatpush1.bf16.msra.mxu0 %v2098_v1  ;;  %1890 = vmatpush3.bf16.msra.mxu1 %v2099_v17 }
 0x673   :  { %1314 = vmatprep.subr.bf16.mxu0 %v2100_v18  ;;  %1891 = vmatprep.subr.bf16.mxu1 %v2249_v0 }
 0x676   :  { %1315 = vmatpush1.bf16.msra.mxu0 %v2101_v19  ;;  %1892 = vmatpush3.bf16.msra.mxu1 %v2102_v20 }
 0x677   :  { %1316 = vmatprep.subr.bf16.mxu0 %v2103_v21  ;;  %1893 = vmatprep.subr.bf16.mxu1 %v2249_v0 }
 0x67a   :  { %1317 = vmatpush1.bf16.msra.mxu0 %v2104_v22  ;;  %1894 = vmatpush3.bf16.msra.mxu1 %v2105_v23  ;;  %v1395_v22 = vrot.slane %v1304_v13, 1 }
 0x67b   :  { %1318 = vmatprep.subr.bf16.mxu0 %v2106_v24  ;;  %1895 = vmatprep.subr.bf16.mxu1 %v2249_v0 }
 0x67e   :  { %1319 = vmatpush1.bf16.msra.mxu0 %v2107_v25  ;;  %1896 = vmatpush3.bf16.msra.mxu1 %v2108_v27 }
 0x67f   :  { %1320 = vmatprep.subr.bf16.mxu0 %v2109_v52  ;;  %1897 = vmatprep.subr.bf16.mxu1 %v2249_v0 }
 0x682   :  { %1321 = vmatpush1.bf16.msra.mxu0 %v2110_v53  ;;  %1898 = vmatpush3.bf16.msra.mxu1 %v2410_v51 }
 0x683   :  { %1903 = vmatprep.subr.bf16.mxu0 %v2249_v0 }
 0x725   :  { %v1229_v54 = vpop.f32.mrf.mxu0  ;;  %v1270_v55 = vpop.f32.mrf.mxu1 }
 0x726   :  { %v1230_v56 = vadd.f32 %v1229_v54, %v2460_v12  ;;  %v1271_v43 = vadd.f32 %v1270_v55, %v2466_v58  ;;  %v1405_v55 = vrot.slane %v1304_v13, 2 }
 0x727   :  { %v1231_v28 = vpop.f32.mrf.mxu0  ;;  %v1881_v29 = vpop.f32.mrf.mxu1 }
 0x728   :  { %v1276_v30 = vadd.f32 %v1230_v56, %v1193_v59  ;;  %v1232_v34 = vadd.f32 %v1231_v28, %v2462_v14 }
 0x729   :  { %v1233_v31 = vpop.f32.mrf.mxu0  ;;  %v1273_v32 = vpop.f32.mrf.mxu1 }
 0x72a   :  { %v1620_v33 = vmul.f32 -1.442695, %v1276_v30  ;;  %v1286_v51 = vadd.f32 %v1284_v37, %v1232_v34 }
 0x72b   :  { %v1234_v35 = vpop.f32.mrf.mxu0  ;;  %v1882_v36 = vpop.f32.mrf.mxu1 }
 0x72c   :  { %2068 = vpow2.f32 %v1620_v33  ;;  %v1621_v38 = vmul.f32 -1.442695, %v1286_v51 }
 0x72e   :  { %2070 = vpow2.f32 %v1621_v38 }
 0x739   :  { %v2069_v39 = vpop.eup %2068 }
 0x73a   :  { %v1280_v40 = vadd.f32 1.0, %v2069_v39 }
 0x73b   :  { %v2071_v41 = vpop.eup %2070 }
 0x73c   :  { %2072 = vrcp.f32 %v1280_v40  ;;  %v1290_v42 = vadd.f32 1.0, %v2071_v41 }
 0x73e   :  { %2074 = vrcp.f32 %v1290_v42 }
 0x749   :  { %v2073_v44 = vpop.eup %2072 }
 0x74a   :  { %v1293_v45 = vmul.f32 %v2073_v44, %v1271_v43 }
 0x74b   :  { %v2075_v48 = vpop.eup %2074 }
 0x74c   :  { %v1296_v47 = vadd.f32 %v1294_v46, %v1293_v45  ;;  %v1298_v49 = vsub.f32 1.0, %v2075_v48  ;;  %v1300_v62 = vmul.f32 %v2075_v48, %v2689_v7  ;;  %v2004_v7 = vld [vmem:[#allocation10 + $0x18] sm:$0xff]  }
 0x74e   :  { %2076 = vtanh.f32 %v1296_v47 }
 0x75b   :  { %v2077_v60 = vpop.eup %2076 }
 0x75c   :  { %v1299_v61 = vmul.f32 %v2077_v60, %v1298_v49 }
 0x75e   :  { %v2710_v63 = vadd.f32 %v1300_v62, %v1299_v61 }
 0x760   :  { %1302 = vst [vmem:[#allocation3 + $0x6] sm:$0x1] %v2710_v63  ;;  %v1305_v2 = vpack.c.bf16 %v2710_v63, %v2710_v63 }
 0x762   :  { %1339 = vmatmul.mubr.bf16.vlgmr.msra.gmra.mxu0 %v1305_v2  ;;  %1900 = vmatmul.mubr.bf16.vlgmr.msra.gmra.mxu1 %v1305_v2 }
 0x763   :  { %1919 = vmatprep.mubr.msk.bf16.mxu0 %vm2251_vm0, %v2249_v0  ;;  %1904 = vmatpush3.bf16.msra.mxu0 %v2000_v3 }
 0x764   :  { %1905 = vmatprep.subr.bf16.mxu0 %v2249_v0 }
 0x767   :  { %1906 = vmatpush3.bf16.msra.mxu0 %v2001_v4 }
 0x768   :  { %1907 = vmatprep.subr.bf16.mxu0 %v2249_v0 }
 0x76b   :  { %1908 = vmatpush3.bf16.msra.mxu0 %v2002_v5 }
 0x76c   :  { %1909 = vmatprep.subr.bf16.mxu0 %v2249_v0 }
 0x76f   :  { %1910 = vmatpush3.bf16.msra.mxu0 %v2003_v6 }
 0x770   :  { %1911 = vmatprep.subr.bf16.mxu0 %v2249_v0 }
 0x773   :  { %1912 = vmatpush3.bf16.msra.mxu0 %v2004_v7 }
 0x774   :  { %1913 = vmatprep.subr.bf16.mxu0 %v2249_v0 }
 0x777   :  { %1914 = vmatpush3.bf16.msra.mxu0 %v2005_v8 }
 0x778   :  { %1915 = vmatprep.subr.bf16.mxu0 %v2249_v0 }
 0x77b   :  { %1916 = vmatpush3.bf16.msra.mxu0 %v2006_v9 }
 0x77c   :  { %1917 = vmatprep.subr.bf16.mxu0 %v2249_v0 }
 0x77f   :  { %1918 = vmatpush3.bf16.msra.mxu0 %v2007_v57 }
 0x822   :  { %v1340_v50 = vpop.f32.mrf.mxu0  ;;  %v1381_v10 = vpop.f32.mrf.mxu1 }
 0x823   :  { %v1341_v11 = vadd.f32 %v1340_v50, %v2460_v12  ;;  %v1382_v52 = vadd.f32 %v1381_v10, %v2466_v58 }
 0x824   :  { %v1342_v15 = vpop.f32.mrf.mxu0  ;;  %v1901_v26 = vpop.f32.mrf.mxu1 }
 0x825   :  { %v1387_v16 = vadd.f32 %v1341_v11, %v1304_v13  ;;  %v1343_v19 = vadd.f32 %v1342_v15, %v2462_v14 }
 0x826   :  { %v1344_v1 = vpop.f32.mrf.mxu0  ;;  %v1384_v17 = vpop.f32.mrf.mxu1 }
 0x827   :  { %v1622_v18 = vmul.f32 -1.442695, %v1387_v16  ;;  %v1397_v23 = vadd.f32 %v1395_v22, %v1343_v19 }
 0x828   :  { %v1345_v20 = vpop.f32.mrf.mxu0  ;;  %v1902_v21 = vpop.f32.mrf.mxu1 }
 0x829   :  { %2078 = vpow2.f32 %v1622_v18  ;;  %v1623_v0 = vmul.f32 -1.442695, %v1397_v23 }
 0x82b   :  { %2080 = vpow2.f32 %v1623_v0 }
 0x836   :  { %v2079_v24 = vpop.eup %2078 }
 0x837   :  { %v1391_v25 = vadd.f32 1.0, %v2079_v24 }
 0x838   :  { %v2081_v12 = vpop.eup %2080 }
 0x839   :  { %2082 = vrcp.f32 %v1391_v25  ;;  %v1401_v27 = vadd.f32 1.0, %v2081_v12 }
 0x83b   :  { %2084 = vrcp.f32 %v1401_v27 }
 0x846   :  { %v2083_v53 = vpop.eup %2082 }
 0x847   :  { %v1404_v54 = vmul.f32 %v2083_v53, %v1382_v52 }
 0x848   :  { %v2085_v14 = vpop.eup %2084 }
 0x849   :  { %v1407_v56 = vadd.f32 %v1405_v55, %v1404_v54  ;;  %v1409_v59 = vsub.f32 1.0, %v2085_v14  ;;  %v1411_v30 = vmul.f32 %v2085_v14, %v2710_v63 }
 0x84b   :  { %2086 = vtanh.f32 %v1407_v56 }
 0x858   :  { %v2087_v28 = vpop.eup %2086 }
 0x859   :  { %v1410_v29 = vmul.f32 %v2087_v28, %v1409_v59 }
 0x85b   :  { %v1412_v31 = vadd.f32 %v1411_v30, %v1410_v29 }
 0x85d   :  { %1413 = vst [vmem:[#allocation3 + $0x7] sm:$0x1] %v1412_v31  ;;  %1414 = vst [vmem:[#allocation13] sm:$0x1] %v1412_v31 }
 0x864   :  { %v1415_v32 = vld [vmem:[#allocation3] sm:$0xff] }
 0x865   :  { %v1416_v33 = vpack.c.bf16 %v1415_v32, %v1415_v32 }
 0x867   :  { %1920 = vmatmul.mubr.bf16.vlgmr.msra.gmra.mxu0 %v1416_v33 }
 0x868   :  { %2202 = shalt.err (!%p2199_p10)
}
 0x869   :  { %1548 = dma.vmem_to_hbm [thread:$0]  %s1546_s12, 16, %s2746_s9, [#allocation14]   ;;  %v1624_v58 = vld [vmem:[%s2744_s7] ss:$0 sm:$0xff] }
 0x86a   :  { %s2253_s19 = smov [#allocation12]  }
 0x86b   :  { %s1535_s20 = sshll.u32 %s2253_s19, 4  ;;  %s1536_s20 = int_to_ptr.vmem [resolvable:$true] %s1535_s20 }
 0x86c   :  { %s2211_s21 = scalar_lea.vmem %s1536_s20, 128  ;;  %p2216_p12 = scmp.lt.s32.totalorder %s1536_s20, %s1536_s20 }
 0x86d   :  { %p2212_p11 = scmp.ne.s32.totalorder %s1536_s20, %s2211_s21  ;;  %p2217_p13 = scmp.lt.s32.totalorder %s2211_s21, %s2211_s21 }
 0x86f   :  { %p2218_p0 = por %p2217_p13, %p2216_p12 }
 0x871   :  { %p2219_p1 = pnand %p2218_p0, %p2212_p11 }
 0x927   :  { %v1522_v34 = vpop.f32.mrf.mxu0 }
 0x928   :  { %v1523_v35 = vadd.f32 %v1624_v58, %v1522_v34 }
 0x929   :  { %v1921_v36 = vpop.f32.mrf.mxu0 }
 0x92a   :  { %1528 = vst [vmem:[#allocation12] sm:$0xff] %v1523_v35 }
 0x92b   :  { %v1525_v37 = vpop.f32.mrf.mxu0 }
 0x92c   :  { %2222 = shalt.err (!%p2219_p1)
}
 0x92d   :  { %1538 = dma.vmem_to_hbm [thread:$0]  %s1536_s20, 128, %s2745_s8, [#allocation6]   ;;  %v1922_v51 = vpop.f32.mrf.mxu0 }
 0x92e   :  { %2237 = dma.done.wait [#allocation6], 128  }
 0x92f   :  { %2238 = vsyncadd [#allocation6], 4294967168 }
 0x930   :  { %2239 = dma.done.wait [#allocation14], 16  }
 0x931   :  { %2240 = vsyncadd [#allocation14], 4294967280 }
 0x932   :  { %1555 = vsyncpa [#allocation5], 1 }
 0x933   :  { %1556 = vsyncpa [#allocation8], 1 }
 0x934   :  { %1557 = vsyncpa [#allocation11], 1 }
 0x935   :  { %1558 = vsyncpa [#allocation6], 1 }
 0x936   :  { %1559 = vsyncpa [#allocation14], 1 }

</bundles_post_ra>
